<compile_context>
chip_gen: v5e
topology: v5e:2x2
jax: 0.10.0
libtpu: 0.0.40
codegen_flags: <defaults>
</compile_context>

<pallas_src>
import functools

import jax
import jax.numpy as jnp
from jax.experimental import pallas as pl
from jax.experimental.pallas import tpu as pltpu

SUBLANE = 8


def _round_up(x, m):
    return (x + m - 1) // m * m


# --------------------------- fused forward kernel -----------------------------
def make_fused_kernel(num_layers, T, Bp, H):
    def kernel(x_ref, *refs):
        lstm_refs = refs[:3 * num_layers]
        w1_ref, b1_ref, w2_ref, b2_ref, out_ref, hseq_ref = refs[3 * num_layers:]

        h = None
        for l in range(num_layers):
            # Layer input, time-major 2D: row t*Bp + b.
            x_all = x_ref[...] if l == 0 else hseq_ref[...]        # (T*Bp, in)
            Wih = lstm_refs[3 * l + 0][...]                        # (in, 4H)
            Whh = lstm_refs[3 * l + 1][...]                        # (H, 4H)
            b = lstm_refs[3 * l + 2][...]                          # (1, 4H)

            # Hoisted batched input projection with the bias folded in:
            # one (T*Bp, in) x (in, 4H) matmul per layer, off the serial chain.
            xg = jnp.dot(x_all, Wih, preferred_element_type=jnp.float32) + b

            h = jnp.zeros((Bp, H), jnp.float32)
            c = jnp.zeros((Bp, H), jnp.float32)
            last_layer = (l == num_layers - 1)

            for t in range(T):                   # fully unrolled (T=8), VMEM only
                # Serial critical path: one small (Bp,H)x(H,4H) MXU matmul.
                gates = xg[t * Bp:(t + 1) * Bp, :] + jnp.dot(
                    h, Whh, preferred_element_type=jnp.float32)    # (Bp, 4H)
                # Gate order i | f | o | g (sigmoid-contiguous): one sigmoid
                # over 3H lanes + one tanh over H lanes per step.
                sg = jax.nn.sigmoid(gates[:, :3 * H])
                g_g = jnp.tanh(gates[:, 3 * H:])
                c = sg[:, H:2 * H] * c + sg[:, :H] * g_g
                h = sg[:, 2 * H:3 * H] * jnp.tanh(c)
                if not last_layer:
                    # Hand the hidden sequence to the next layer via VMEM
                    # scratch (bounds live ranges; feeds its batched projection).
                    hseq_ref[pl.ds(t * Bp, Bp), :] = h

        # Head (runs once, off the recurrence): last timestep ->
        # Linear(32) -> ReLU -> Linear(out).  Unpadded head weights.
        h1 = jnp.maximum(
            jnp.dot(h, w1_ref[...], preferred_element_type=jnp.float32) + b1_ref[...],
            0.0)
        out_ref[...] = (jnp.dot(h1, w2_ref[...], preferred_element_type=jnp.float32)
                        + b2_ref[...])

    return kernel


# --------------------------------- forward ------------------------------------
@functools.partial(jax.jit, static_argnames=("output_size",))
def my_lstm_with_softmax_forward(x_btf, kparams, *, output_size):
    """x_btf: (B, T, input_size) float32, batch_first like the PyTorch module."""
    B, T, F = x_btf.shape
    Bp = _round_up(max(B, SUBLANE), SUBLANE)
    H = kparams["lstm"][0]["w_hh"].shape[0]
    OUT = kparams["b2"].shape[1]
    num_layers = len(kparams["lstm"])

    # Time-major 2D layout (T*Bp, F); padded batch rows are zero and sliced off.
    x_tm = jnp.transpose(x_btf.astype(jnp.float32), (1, 0, 2))      # (T, B, F)
    x_tm = jnp.pad(x_tm, ((0, 0), (0, Bp - B), (0, 0))).reshape(T * Bp, F)

    args = [x_tm]
    for layer in kparams["lstm"]:
        args.extend([layer["w_ih"], layer["w_hh"], layer["b"]])
    args.extend([kparams["w1"], kparams["b1"], kparams["w2"], kparams["b2"]])

    out_pad = pl.pallas_call(
        make_fused_kernel(num_layers, T, Bp, H),
        out_shape=jax.ShapeDtypeStruct((Bp, OUT), jnp.float32),
        scratch_shapes=[pltpu.VMEM((T * Bp, H), jnp.float32)],
    )(*args)
    return out_pad[:B, :output_size]


# ----------------------- parameter packing for the kernel ----------------------
def _reorder_gate_cols(w_t, H):
    """(rows, 4H) with PyTorch gate order i|f|g|o -> i|f|o|g (sigmoid-contiguous)."""
    return jnp.concatenate(
        [w_t[:, 0 * H:1 * H], w_t[:, 1 * H:2 * H],
         w_t[:, 3 * H:4 * H], w_t[:, 2 * H:3 * H]], axis=1)


def _reorder_gate_vec(b, H):
    return jnp.concatenate([b[0 * H:1 * H], b[1 * H:2 * H],
                            b[3 * H:4 * H], b[2 * H:3 * H]])


def pack_params(raw, input_size, hidden_size, output_size):
    """PyTorch-convention raw weights -> pre-transposed, gate-reordered params.

    No zero-padding: gates pack contiguously to 4*H lanes and contraction dims
    keep their natural sizes (lane/sublane padding happens in VMEM for free)."""
    H = hidden_size
    layers = []
    for lp in raw["lstm"]:
        w_ih_t = jnp.asarray(lp["w_ih"]).T          # (in, 4H)
        w_hh_t = jnp.asarray(lp["w_hh"]).T          # (H, 4H)
        b = jnp.asarray(lp["b_ih"]) + jnp.asarray(lp["b_hh"])
        layers.append({
            "w_ih": _reorder_gate_cols(w_ih_t, H).astype(jnp.float32),
            "w_hh": _reorder_gate_cols(w_hh_t, H).astype(jnp.float32),
            "b": _reorder_gate_vec(b, H)[None, :].astype(jnp.float32),
        })
    return {
        "lstm": layers,
        "w1": jnp.asarray(raw["w1"]).T.astype(jnp.float32),          # (H, 32)
        "b1": jnp.asarray(raw["b1"])[None, :].astype(jnp.float32),   # (1, 32)
        "w2": jnp.asarray(raw["w2"]).T.astype(jnp.float32),          # (32, out)
        "b2": jnp.asarray(raw["b2"])[None, :].astype(jnp.float32),   # (1, out)
    }


# ------------------------------ parameter init ---------------------------------
def init_raw_params(key, input_size, hidden_size, output_size, num_layers):
    """PyTorch-layout (out, in) weights, separate b_ih/b_hh, uniform(-k, k) init."""
    keys = jax.random.split(key, num_layers * 4 + 4)
    idx = 0
    k_lstm = 1.0 / float(hidden_size) ** 0.5
    layers = []
    for l in range(num_layers):
        in_f = input_size if l == 0 else hidden_size
        w_ih = jax.random.uniform(keys[idx], (4 * hidden_size, in_f),
                                  minval=-k_lstm, maxval=k_lstm); idx += 1
        w_hh = jax.random.uniform(keys[idx], (4 * hidden_size, hidden_size),
                                  minval=-k_lstm, maxval=k_lstm); idx += 1
        b_ih = jax.random.uniform(keys[idx], (4 * hidden_size,),
                                  minval=-k_lstm, maxval=k_lstm); idx += 1
        b_hh = jax.random.uniform(keys[idx], (4 * hidden_size,),
                                  minval=-k_lstm, maxval=k_lstm); idx += 1
        layers.append({"w_ih": w_ih.astype(jnp.float32),
                       "w_hh": w_hh.astype(jnp.float32),
                       "b_ih": b_ih.astype(jnp.float32),
                       "b_hh": b_hh.astype(jnp.float32)})
    k1 = 1.0 / float(hidden_size) ** 0.5
    w1 = jax.random.uniform(keys[idx], (32, hidden_size), minval=-k1, maxval=k1); idx += 1
    b1 = jax.random.uniform(keys[idx], (32,), minval=-k1, maxval=k1); idx += 1
    k2 = 1.0 / float(32) ** 0.5
    w2 = jax.random.uniform(keys[idx], (output_size, 32), minval=-k2, maxval=k2); idx += 1
    b2 = jax.random.uniform(keys[idx], (output_size,), minval=-k2, maxval=k2); idx += 1
    return {"lstm": layers,
            "w1": w1.astype(jnp.float32), "b1": b1.astype(jnp.float32),
            "w2": w2.astype(jnp.float32), "b2": b2.astype(jnp.float32)}


# ------------------------------ pure-JAX reference ------------------------------
def ref_forward(x_btf, raw):
    B, T, _ = x_btf.shape
    x = x_btf
    for lp in raw["lstm"]:
        H = lp["w_hh"].shape[1]
        h = jnp.zeros((B, H), jnp.float32)
        c = jnp.zeros((B, H), jnp.float32)
        outs = []
        for t in range(T):
            gates = (x[:, t] @ lp["w_ih"].T + lp["b_ih"]
                     + h @ lp["w_hh"].T + lp["b_hh"])
            i = jax.nn.sigmoid(gates[:, :H])
            f = jax.nn.sigmoid(gates[:, H:2 * H])
            g = jnp.tanh(gates[:, 2 * H:3 * H])
            o = jax.nn.sigmoid(gates[:, 3 * H:])
            c = f * c + i * g
            h = o * jnp.tanh(c)
            outs.append(h)
        x = jnp.stack(outs, axis=1)
    h_last = x[:, -1]
    h1 = jnp.maximum(h_last @ raw["w1"].T + raw["b1"], 0.0)
    return h1 @ raw["w2"].T + raw["b2"]


if __name__ == "__main__":
    B, T = 2, 8
    INPUT_SIZE, HIDDEN_SIZE, OUTPUT_SIZE, NUM_LAYERS = 16, 32, 4, 2

    key = jax.random.PRNGKey(0)
    kx, kp = jax.random.split(key)
    x = jax.random.normal(kx, (B, T, INPUT_SIZE), dtype=jnp.float32)

    raw = init_raw_params(kp, INPUT_SIZE, HIDDEN_SIZE, OUTPUT_SIZE, NUM_LAYERS)
    kparams = pack_params(raw, INPUT_SIZE, HIDDEN_SIZE, OUTPUT_SIZE)

    out = my_lstm_with_softmax_forward(x, kparams, output_size=OUTPUT_SIZE)
    out = jax.block_until_ready(out)

    ref = jax.block_until_ready(ref_forward(x, raw))
    assert out.shape == (B, OUTPUT_SIZE)
    assert jnp.allclose(out, ref, atol=1e-4, rtol=1e-4), (out, ref)

    print("KERNEL_OK")
</pallas_src>

<mosaic_0001>
module attributes {stable_mosaic.version = 11 : i64} {
  func.func @kernel(%arg0: memref<64x16xf32, #tpu.memory_space<vmem>>, %arg1: memref<16x128xf32, #tpu.memory_space<vmem>>, %arg2: memref<32x128xf32, #tpu.memory_space<vmem>>, %arg3: memref<1x128xf32, #tpu.memory_space<vmem>>, %arg4: memref<32x128xf32, #tpu.memory_space<vmem>>, %arg5: memref<32x128xf32, #tpu.memory_space<vmem>>, %arg6: memref<1x128xf32, #tpu.memory_space<vmem>>, %arg7: memref<32x32xf32, #tpu.memory_space<vmem>>, %arg8: memref<1x32xf32, #tpu.memory_space<vmem>>, %arg9: memref<32x4xf32, #tpu.memory_space<vmem>>, %arg10: memref<1x4xf32, #tpu.memory_space<vmem>>, %arg11: memref<8x4xf32, #tpu.memory_space<vmem>>, %arg12: memref<64x32xf32, #tpu.memory_space<vmem>>) attributes {dimension_semantics = [], scalar_prefetch = 0 : i64, scratch_operands = 1 : i64, tpu.core_type = #tpu.core_type<tc>} {
    %c0 = arith.constant 0 : index
    %c0_0 = arith.constant 0 : index
    %0 = vector.load %arg0[%c0, %c0_0] : memref<64x16xf32, #tpu.memory_space<vmem>>, vector<64x16xf32>
    %c0_1 = arith.constant 0 : index
    %c0_2 = arith.constant 0 : index
    %1 = vector.load %arg1[%c0_1, %c0_2] : memref<16x128xf32, #tpu.memory_space<vmem>>, vector<16x128xf32>
    %c0_3 = arith.constant 0 : index
    %c0_4 = arith.constant 0 : index
    %2 = vector.load %arg2[%c0_3, %c0_4] : memref<32x128xf32, #tpu.memory_space<vmem>>, vector<32x128xf32>
    %c0_5 = arith.constant 0 : index
    %c0_6 = arith.constant 0 : index
    %3 = vector.load %arg3[%c0_5, %c0_6] : memref<1x128xf32, #tpu.memory_space<vmem>>, vector<1x128xf32>
    %cst = arith.constant dense<0.000000e+00> : vector<64x128xf32>
    %4 = tpu.matmul %0, %1, %cst {dimension_numbers = #tpu.dot_dimension_numbers<[1], [0], [0], [1], [0, 0, 1, 1], [], []>} : vector<64x16xf32>, vector<16x128xf32>, vector<64x128xf32> -> vector<64x128xf32>
    %5 = vector.broadcast %3 : vector<1x128xf32> to vector<64x128xf32>
    %6 = arith.addf %4, %5 : vector<64x128xf32>
    %cst_7 = arith.constant 0.000000e+00 : f32
    %7 = vector.broadcast %cst_7 : f32 to vector<8x32xf32>
    %cst_8 = arith.constant 0.000000e+00 : f32
    %8 = vector.broadcast %cst_8 : f32 to vector<8x32xf32>
    %9 = vector.extract_strided_slice %6 {offsets = [0, 0], sizes = [8, 128], strides = [1, 1]} : vector<64x128xf32> to vector<8x128xf32>
    %cst_9 = arith.constant dense<0.000000e+00> : vector<8x128xf32>
    %10 = tpu.matmul %7, %2, %cst_9 {dimension_numbers = #tpu.dot_dimension_numbers<[1], [0], [0], [1], [0, 0, 1, 1], [], []>} : vector<8x32xf32>, vector<32x128xf32>, vector<8x128xf32> -> vector<8x128xf32>
    %11 = arith.addf %9, %10 : vector<8x128xf32>
    %12 = vector.extract_strided_slice %11 {offsets = [0, 0], sizes = [8, 96], strides = [1, 1]} : vector<8x128xf32> to vector<8x96xf32>
    %13 = arith.negf %12 : vector<8x96xf32>
    %14 = math.exp %13 : vector<8x96xf32>
    %cst_10 = arith.constant 1.000000e+00 : f32
    %15 = vector.broadcast %cst_10 : f32 to vector<8x96xf32>
    %16 = arith.addf %15, %14 : vector<8x96xf32>
    %17 = arith.divf %15, %16 : vector<8x96xf32>
    %18 = vector.extract_strided_slice %11 {offsets = [0, 96], sizes = [8, 32], strides = [1, 1]} : vector<8x128xf32> to vector<8x32xf32>
    %19 = math.tanh %18 : vector<8x32xf32>
    %20 = vector.extract_strided_slice %17 {offsets = [0, 32], sizes = [8, 32], strides = [1, 1]} : vector<8x96xf32> to vector<8x32xf32>
    %21 = arith.mulf %20, %8 : vector<8x32xf32>
    %22 = vector.extract_strided_slice %17 {offsets = [0, 0], sizes = [8, 32], strides = [1, 1]} : vector<8x96xf32> to vector<8x32xf32>
    %23 = arith.mulf %22, %19 : vector<8x32xf32>
    %24 = arith.addf %21, %23 : vector<8x32xf32>
    %25 = vector.extract_strided_slice %17 {offsets = [0, 64], sizes = [8, 32], strides = [1, 1]} : vector<8x96xf32> to vector<8x32xf32>
    %26 = math.tanh %24 : vector<8x32xf32>
    %27 = arith.mulf %25, %26 : vector<8x32xf32>
    %c0_11 = arith.constant 0 : index
    %c0_12 = arith.constant 0 : index
    %28 = vector.load %arg12[%c0_11, %c0_12] : memref<64x32xf32, #tpu.memory_space<vmem>>, vector<8x32xf32>
    tpu.vector_store %arg12[%c0_11, %c0_12], %27 {strides = array<i32>} : memref<64x32xf32, #tpu.memory_space<vmem>>, vector<8x32xf32>,
    %29 = vector.extract_strided_slice %6 {offsets = [8, 0], sizes = [8, 128], strides = [1, 1]} : vector<64x128xf32> to vector<8x128xf32>
    %cst_13 = arith.constant dense<0.000000e+00> : vector<8x128xf32>
    %30 = tpu.matmul %27, %2, %cst_13 {dimension_numbers = #tpu.dot_dimension_numbers<[1], [0], [0], [1], [0, 0, 1, 1], [], []>} : vector<8x32xf32>, vector<32x128xf32>, vector<8x128xf32> -> vector<8x128xf32>
    %31 = arith.addf %29, %30 : vector<8x128xf32>
    %32 = vector.extract_strided_slice %31 {offsets = [0, 0], sizes = [8, 96], strides = [1, 1]} : vector<8x128xf32> to vector<8x96xf32>
    %33 = arith.negf %32 : vector<8x96xf32>
    %34 = math.exp %33 : vector<8x96xf32>
    %cst_14 = arith.constant 1.000000e+00 : f32
    %35 = vector.broadcast %cst_14 : f32 to vector<8x96xf32>
    %36 = arith.addf %35, %34 : vector<8x96xf32>
    %37 = arith.divf %35, %36 : vector<8x96xf32>
    %38 = vector.extract_strided_slice %31 {offsets = [0, 96], sizes = [8, 32], strides = [1, 1]} : vector<8x128xf32> to vector<8x32xf32>
    %39 = math.tanh %38 : vector<8x32xf32>
    %40 = vector.extract_strided_slice %37 {offsets = [0, 32], sizes = [8, 32], strides = [1, 1]} : vector<8x96xf32> to vector<8x32xf32>
    %41 = arith.mulf %40, %24 : vector<8x32xf32>
    %42 = vector.extract_strided_slice %37 {offsets = [0, 0], sizes = [8, 32], strides = [1, 1]} : vector<8x96xf32> to vector<8x32xf32>
    %43 = arith.mulf %42, %39 : vector<8x32xf32>
    %44 = arith.addf %41, %43 : vector<8x32xf32>
    %45 = vector.extract_strided_slice %37 {offsets = [0, 64], sizes = [8, 32], strides = [1, 1]} : vector<8x96xf32> to vector<8x32xf32>
    %46 = math.tanh %44 : vector<8x32xf32>
    %47 = arith.mulf %45, %46 : vector<8x32xf32>
    %c8 = arith.constant 8 : index
    %c0_15 = arith.constant 0 : index
    %48 = vector.load %arg12[%c8, %c0_15] : memref<64x32xf32, #tpu.memory_space<vmem>>, vector<8x32xf32>
    tpu.vector_store %arg12[%c8, %c0_15], %47 {strides = array<i32>} : memref<64x32xf32, #tpu.memory_space<vmem>>, vector<8x32xf32>,
    %49 = vector.extract_strided_slice %6 {offsets = [16, 0], sizes = [8, 128], strides = [1, 1]} : vector<64x128xf32> to vector<8x128xf32>
    %cst_16 = arith.constant dense<0.000000e+00> : vector<8x128xf32>
    %50 = tpu.matmul %47, %2, %cst_16 {dimension_numbers = #tpu.dot_dimension_numbers<[1], [0], [0], [1], [0, 0, 1, 1], [], []>} : vector<8x32xf32>, vector<32x128xf32>, vector<8x128xf32> -> vector<8x128xf32>
    %51 = arith.addf %49, %50 : vector<8x128xf32>
    %52 = vector.extract_strided_slice %51 {offsets = [0, 0], sizes = [8, 96], strides = [1, 1]} : vector<8x128xf32> to vector<8x96xf32>
    %53 = arith.negf %52 : vector<8x96xf32>
    %54 = math.exp %53 : vector<8x96xf32>
    %cst_17 = arith.constant 1.000000e+00 : f32
    %55 = vector.broadcast %cst_17 : f32 to vector<8x96xf32>
    %56 = arith.addf %55, %54 : vector<8x96xf32>
    %57 = arith.divf %55, %56 : vector<8x96xf32>
    %58 = vector.extract_strided_slice %51 {offsets = [0, 96], sizes = [8, 32], strides = [1, 1]} : vector<8x128xf32> to vector<8x32xf32>
    %59 = math.tanh %58 : vector<8x32xf32>
    %60 = vector.extract_strided_slice %57 {offsets = [0, 32], sizes = [8, 32], strides = [1, 1]} : vector<8x96xf32> to vector<8x32xf32>
    %61 = arith.mulf %60, %44 : vector<8x32xf32>
    %62 = vector.extract_strided_slice %57 {offsets = [0, 0], sizes = [8, 32], strides = [1, 1]} : vector<8x96xf32> to vector<8x32xf32>
    %63 = arith.mulf %62, %59 : vector<8x32xf32>
    %64 = arith.addf %61, %63 : vector<8x32xf32>
    %65 = vector.extract_strided_slice %57 {offsets = [0, 64], sizes = [8, 32], strides = [1, 1]} : vector<8x96xf32> to vector<8x32xf32>
    %66 = math.tanh %64 : vector<8x32xf32>
    %67 = arith.mulf %65, %66 : vector<8x32xf32>
    %c16 = arith.constant 16 : index
    %c0_18 = arith.constant 0 : index
    %68 = vector.load %arg12[%c16, %c0_18] : memref<64x32xf32, #tpu.memory_space<vmem>>, vector<8x32xf32>
    tpu.vector_store %arg12[%c16, %c0_18], %67 {strides = array<i32>} : memref<64x32xf32, #tpu.memory_space<vmem>>, vector<8x32xf32>,
    %69 = vector.extract_strided_slice %6 {offsets = [24, 0], sizes = [8, 128], strides = [1, 1]} : vector<64x128xf32> to vector<8x128xf32>
    %cst_19 = arith.constant dense<0.000000e+00> : vector<8x128xf32>
    %70 = tpu.matmul %67, %2, %cst_19 {dimension_numbers = #tpu.dot_dimension_numbers<[1], [0], [0], [1], [0, 0, 1, 1], [], []>} : vector<8x32xf32>, vector<32x128xf32>, vector<8x128xf32> -> vector<8x128xf32>
    %71 = arith.addf %69, %70 : vector<8x128xf32>
    %72 = vector.extract_strided_slice %71 {offsets = [0, 0], sizes = [8, 96], strides = [1, 1]} : vector<8x128xf32> to vector<8x96xf32>
    %73 = arith.negf %72 : vector<8x96xf32>
    %74 = math.exp %73 : vector<8x96xf32>
    %cst_20 = arith.constant 1.000000e+00 : f32
    %75 = vector.broadcast %cst_20 : f32 to vector<8x96xf32>
    %76 = arith.addf %75, %74 : vector<8x96xf32>
    %77 = arith.divf %75, %76 : vector<8x96xf32>
    %78 = vector.extract_strided_slice %71 {offsets = [0, 96], sizes = [8, 32], strides = [1, 1]} : vector<8x128xf32> to vector<8x32xf32>
    %79 = math.tanh %78 : vector<8x32xf32>
    %80 = vector.extract_strided_slice %77 {offsets = [0, 32], sizes = [8, 32], strides = [1, 1]} : vector<8x96xf32> to vector<8x32xf32>
    %81 = arith.mulf %80, %64 : vector<8x32xf32>
    %82 = vector.extract_strided_slice %77 {offsets = [0, 0], sizes = [8, 32], strides = [1, 1]} : vector<8x96xf32> to vector<8x32xf32>
    %83 = arith.mulf %82, %79 : vector<8x32xf32>
    %84 = arith.addf %81, %83 : vector<8x32xf32>
    %85 = vector.extract_strided_slice %77 {offsets = [0, 64], sizes = [8, 32], strides = [1, 1]} : vector<8x96xf32> to vector<8x32xf32>
    %86 = math.tanh %84 : vector<8x32xf32>
    %87 = arith.mulf %85, %86 : vector<8x32xf32>
    %c24 = arith.constant 24 : index
    %c0_21 = arith.constant 0 : index
    %88 = vector.load %arg12[%c24, %c0_21] : memref<64x32xf32, #tpu.memory_space<vmem>>, vector<8x32xf32>
    tpu.vector_store %arg12[%c24, %c0_21], %87 {strides = array<i32>} : memref<64x32xf32, #tpu.memory_space<vmem>>, vector<8x32xf32>,
    %89 = vector.extract_strided_slice %6 {offsets = [32, 0], sizes = [8, 128], strides = [1, 1]} : vector<64x128xf32> to vector<8x128xf32>
    %cst_22 = arith.constant dense<0.000000e+00> : vector<8x128xf32>
    %90 = tpu.matmul %87, %2, %cst_22 {dimension_numbers = #tpu.dot_dimension_numbers<[1], [0], [0], [1], [0, 0, 1, 1], [], []>} : vector<8x32xf32>, vector<32x128xf32>, vector<8x128xf32> -> vector<8x128xf32>
    %91 = arith.addf %89, %90 : vector<8x128xf32>
    %92 = vector.extract_strided_slice %91 {offsets = [0, 0], sizes = [8, 96], strides = [1, 1]} : vector<8x128xf32> to vector<8x96xf32>
    %93 = arith.negf %92 : vector<8x96xf32>
    %94 = math.exp %93 : vector<8x96xf32>
    %cst_23 = arith.constant 1.000000e+00 : f32
    %95 = vector.broadcast %cst_23 : f32 to vector<8x96xf32>
    %96 = arith.addf %95, %94 : vector<8x96xf32>
    %97 = arith.divf %95, %96 : vector<8x96xf32>
    %98 = vector.extract_strided_slice %91 {offsets = [0, 96], sizes = [8, 32], strides = [1, 1]} : vector<8x128xf32> to vector<8x32xf32>
    %99 = math.tanh %98 : vector<8x32xf32>
    %100 = vector.extract_strided_slice %97 {offsets = [0, 32], sizes = [8, 32], strides = [1, 1]} : vector<8x96xf32> to vector<8x32xf32>
    %101 = arith.mulf %100, %84 : vector<8x32xf32>
    %102 = vector.extract_strided_slice %97 {offsets = [0, 0], sizes = [8, 32], strides = [1, 1]} : vector<8x96xf32> to vector<8x32xf32>
    %103 = arith.mulf %102, %99 : vector<8x32xf32>
    %104 = arith.addf %101, %103 : vector<8x32xf32>
    %105 = vector.extract_strided_slice %97 {offsets = [0, 64], sizes = [8, 32], strides = [1, 1]} : vector<8x96xf32> to vector<8x32xf32>
    %106 = math.tanh %104 : vector<8x32xf32>
    %107 = arith.mulf %105, %106 : vector<8x32xf32>
    %c32 = arith.constant 32 : index
    %c0_24 = arith.constant 0 : index
    %108 = vector.load %arg12[%c32, %c0_24] : memref<64x32xf32, #tpu.memory_space<vmem>>, vector<8x32xf32>
    tpu.vector_store %arg12[%c32, %c0_24], %107 {strides = array<i32>} : memref<64x32xf32, #tpu.memory_space<vmem>>, vector<8x32xf32>,
    %109 = vector.extract_strided_slice %6 {offsets = [40, 0], sizes = [8, 128], strides = [1, 1]} : vector<64x128xf32> to vector<8x128xf32>
    %cst_25 = arith.constant dense<0.000000e+00> : vector<8x128xf32>
    %110 = tpu.matmul %107, %2, %cst_25 {dimension_numbers = #tpu.dot_dimension_numbers<[1], [0], [0], [1], [0, 0, 1, 1], [], []>} : vector<8x32xf32>, vector<32x128xf32>, vector<8x128xf32> -> vector<8x128xf32>
    %111 = arith.addf %109, %110 : vector<8x128xf32>
    %112 = vector.extract_strided_slice %111 {offsets = [0, 0], sizes = [8, 96], strides = [1, 1]} : vector<8x128xf32> to vector<8x96xf32>
    %113 = arith.negf %112 : vector<8x96xf32>
    %114 = math.exp %113 : vector<8x96xf32>
    %cst_26 = arith.constant 1.000000e+00 : f32
    %115 = vector.broadcast %cst_26 : f32 to vector<8x96xf32>
    %116 = arith.addf %115, %114 : vector<8x96xf32>
    %117 = arith.divf %115, %116 : vector<8x96xf32>
    %118 = vector.extract_strided_slice %111 {offsets = [0, 96], sizes = [8, 32], strides = [1, 1]} : vector<8x128xf32> to vector<8x32xf32>
    %119 = math.tanh %118 : vector<8x32xf32>
    %120 = vector.extract_strided_slice %117 {offsets = [0, 32], sizes = [8, 32], strides = [1, 1]} : vector<8x96xf32> to vector<8x32xf32>
    %121 = arith.mulf %120, %104 : vector<8x32xf32>
    %122 = vector.extract_strided_slice %117 {offsets = [0, 0], sizes = [8, 32], strides = [1, 1]} : vector<8x96xf32> to vector<8x32xf32>
    %123 = arith.mulf %122, %119 : vector<8x32xf32>
    %124 = arith.addf %121, %123 : vector<8x32xf32>
    %125 = vector.extract_strided_slice %117 {offsets = [0, 64], sizes = [8, 32], strides = [1, 1]} : vector<8x96xf32> to vector<8x32xf32>
    %126 = math.tanh %124 : vector<8x32xf32>
    %127 = arith.mulf %125, %126 : vector<8x32xf32>
    %c40 = arith.constant 40 : index
    %c0_27 = arith.constant 0 : index
    %128 = vector.load %arg12[%c40, %c0_27] : memref<64x32xf32, #tpu.memory_space<vmem>>, vector<8x32xf32>
    tpu.vector_store %arg12[%c40, %c0_27], %127 {strides = array<i32>} : memref<64x32xf32, #tpu.memory_space<vmem>>, vector<8x32xf32>,
    %129 = vector.extract_strided_slice %6 {offsets = [48, 0], sizes = [8, 128], strides = [1, 1]} : vector<64x128xf32> to vector<8x128xf32>
    %cst_28 = arith.constant dense<0.000000e+00> : vector<8x128xf32>
    %130 = tpu.matmul %127, %2, %cst_28 {dimension_numbers = #tpu.dot_dimension_numbers<[1], [0], [0], [1], [0, 0, 1, 1], [], []>} : vector<8x32xf32>, vector<32x128xf32>, vector<8x128xf32> -> vector<8x128xf32>
    %131 = arith.addf %129, %130 : vector<8x128xf32>
    %132 = vector.extract_strided_slice %131 {offsets = [0, 0], sizes = [8, 96], strides = [1, 1]} : vector<8x128xf32> to vector<8x96xf32>
    %133 = arith.negf %132 : vector<8x96xf32>
    %134 = math.exp %133 : vector<8x96xf32>
    %cst_29 = arith.constant 1.000000e+00 : f32
    %135 = vector.broadcast %cst_29 : f32 to vector<8x96xf32>
    %136 = arith.addf %135, %134 : vector<8x96xf32>
    %137 = arith.divf %135, %136 : vector<8x96xf32>
    %138 = vector.extract_strided_slice %131 {offsets = [0, 96], sizes = [8, 32], strides = [1, 1]} : vector<8x128xf32> to vector<8x32xf32>
    %139 = math.tanh %138 : vector<8x32xf32>
    %140 = vector.extract_strided_slice %137 {offsets = [0, 32], sizes = [8, 32], strides = [1, 1]} : vector<8x96xf32> to vector<8x32xf32>
    %141 = arith.mulf %140, %124 : vector<8x32xf32>
    %142 = vector.extract_strided_slice %137 {offsets = [0, 0], sizes = [8, 32], strides = [1, 1]} : vector<8x96xf32> to vector<8x32xf32>
    %143 = arith.mulf %142, %139 : vector<8x32xf32>
    %144 = arith.addf %141, %143 : vector<8x32xf32>
    %145 = vector.extract_strided_slice %137 {offsets = [0, 64], sizes = [8, 32], strides = [1, 1]} : vector<8x96xf32> to vector<8x32xf32>
    %146 = math.tanh %144 : vector<8x32xf32>
    %147 = arith.mulf %145, %146 : vector<8x32xf32>
    %c48 = arith.constant 48 : index
    %c0_30 = arith.constant 0 : index
    %148 = vector.load %arg12[%c48, %c0_30] : memref<64x32xf32, #tpu.memory_space<vmem>>, vector<8x32xf32>
    tpu.vector_store %arg12[%c48, %c0_30], %147 {strides = array<i32>} : memref<64x32xf32, #tpu.memory_space<vmem>>, vector<8x32xf32>,
    %149 = vector.extract_strided_slice %6 {offsets = [56, 0], sizes = [8, 128], strides = [1, 1]} : vector<64x128xf32> to vector<8x128xf32>
    %cst_31 = arith.constant dense<0.000000e+00> : vector<8x128xf32>
    %150 = tpu.matmul %147, %2, %cst_31 {dimension_numbers = #tpu.dot_dimension_numbers<[1], [0], [0], [1], [0, 0, 1, 1], [], []>} : vector<8x32xf32>, vector<32x128xf32>, vector<8x128xf32> -> vector<8x128xf32>
    %151 = arith.addf %149, %150 : vector<8x128xf32>
    %152 = vector.extract_strided_slice %151 {offsets = [0, 0], sizes = [8, 96], strides = [1, 1]} : vector<8x128xf32> to vector<8x96xf32>
    %153 = arith.negf %152 : vector<8x96xf32>
    %154 = math.exp %153 : vector<8x96xf32>
    %cst_32 = arith.constant 1.000000e+00 : f32
    %155 = vector.broadcast %cst_32 : f32 to vector<8x96xf32>
    %156 = arith.addf %155, %154 : vector<8x96xf32>
    %157 = arith.divf %155, %156 : vector<8x96xf32>
    %158 = vector.extract_strided_slice %151 {offsets = [0, 96], sizes = [8, 32], strides = [1, 1]} : vector<8x128xf32> to vector<8x32xf32>
    %159 = math.tanh %158 : vector<8x32xf32>
    %160 = vector.extract_strided_slice %157 {offsets = [0, 32], sizes = [8, 32], strides = [1, 1]} : vector<8x96xf32> to vector<8x32xf32>
    %161 = arith.mulf %160, %144 : vector<8x32xf32>
    %162 = vector.extract_strided_slice %157 {offsets = [0, 0], sizes = [8, 32], strides = [1, 1]} : vector<8x96xf32> to vector<8x32xf32>
    %163 = arith.mulf %162, %159 : vector<8x32xf32>
    %164 = arith.addf %161, %163 : vector<8x32xf32>
    %165 = vector.extract_strided_slice %157 {offsets = [0, 64], sizes = [8, 32], strides = [1, 1]} : vector<8x96xf32> to vector<8x32xf32>
    %166 = math.tanh %164 : vector<8x32xf32>
    %167 = arith.mulf %165, %166 : vector<8x32xf32>
    %c56 = arith.constant 56 : index
    %c0_33 = arith.constant 0 : index
    %168 = vector.load %arg12[%c56, %c0_33] : memref<64x32xf32, #tpu.memory_space<vmem>>, vector<8x32xf32>
    tpu.vector_store %arg12[%c56, %c0_33], %167 {strides = array<i32>} : memref<64x32xf32, #tpu.memory_space<vmem>>, vector<8x32xf32>,
    %c0_34 = arith.constant 0 : index
    %c0_35 = arith.constant 0 : index
    %169 = vector.load %arg12[%c0_34, %c0_35] : memref<64x32xf32, #tpu.memory_space<vmem>>, vector<64x32xf32>
    %c0_36 = arith.constant 0 : index
    %c0_37 = arith.constant 0 : index
    %170 = vector.load %arg4[%c0_36, %c0_37] : memref<32x128xf32, #tpu.memory_space<vmem>>, vector<32x128xf32>
    %c0_38 = arith.constant 0 : index
    %c0_39 = arith.constant 0 : index
    %171 = vector.load %arg5[%c0_38, %c0_39] : memref<32x128xf32, #tpu.memory_space<vmem>>, vector<32x128xf32>
    %c0_40 = arith.constant 0 : index
    %c0_41 = arith.constant 0 : index
    %172 = vector.load %arg6[%c0_40, %c0_41] : memref<1x128xf32, #tpu.memory_space<vmem>>, vector<1x128xf32>
    %cst_42 = arith.constant dense<0.000000e+00> : vector<64x128xf32>
    %173 = tpu.matmul %169, %170, %cst_42 {dimension_numbers = #tpu.dot_dimension_numbers<[1], [0], [0], [1], [0, 0, 1, 1], [], []>} : vector<64x32xf32>, vector<32x128xf32>, vector<64x128xf32> -> vector<64x128xf32>
    %174 = vector.broadcast %172 : vector<1x128xf32> to vector<64x128xf32>
    %175 = arith.addf %173, %174 : vector<64x128xf32>
    %cst_43 = arith.constant 0.000000e+00 : f32
    %176 = vector.broadcast %cst_43 : f32 to vector<8x32xf32>
    %cst_44 = arith.constant 0.000000e+00 : f32
    %177 = vector.broadcast %cst_44 : f32 to vector<8x32xf32>
    %178 = vector.extract_strided_slice %175 {offsets = [0, 0], sizes = [8, 128], strides = [1, 1]} : vector<64x128xf32> to vector<8x128xf32>
    %cst_45 = arith.constant dense<0.000000e+00> : vector<8x128xf32>
    %179 = tpu.matmul %176, %171, %cst_45 {dimension_numbers = #tpu.dot_dimension_numbers<[1], [0], [0], [1], [0, 0, 1, 1], [], []>} : vector<8x32xf32>, vector<32x128xf32>, vector<8x128xf32> -> vector<8x128xf32>
    %180 = arith.addf %178, %179 : vector<8x128xf32>
    %181 = vector.extract_strided_slice %180 {offsets = [0, 0], sizes = [8, 96], strides = [1, 1]} : vector<8x128xf32> to vector<8x96xf32>
    %182 = arith.negf %181 : vector<8x96xf32>
    %183 = math.exp %182 : vector<8x96xf32>
    %cst_46 = arith.constant 1.000000e+00 : f32
    %184 = vector.broadcast %cst_46 : f32 to vector<8x96xf32>
    %185 = arith.addf %184, %183 : vector<8x96xf32>
    %186 = arith.divf %184, %185 : vector<8x96xf32>
    %187 = vector.extract_strided_slice %180 {offsets = [0, 96], sizes = [8, 32], strides = [1, 1]} : vector<8x128xf32> to vector<8x32xf32>
    %188 = math.tanh %187 : vector<8x32xf32>
    %189 = vector.extract_strided_slice %186 {offsets = [0, 32], sizes = [8, 32], strides = [1, 1]} : vector<8x96xf32> to vector<8x32xf32>
    %190 = arith.mulf %189, %177 : vector<8x32xf32>
    %191 = vector.extract_strided_slice %186 {offsets = [0, 0], sizes = [8, 32], strides = [1, 1]} : vector<8x96xf32> to vector<8x32xf32>
    %192 = arith.mulf %191, %188 : vector<8x32xf32>
    %193 = arith.addf %190, %192 : vector<8x32xf32>
    %194 = vector.extract_strided_slice %186 {offsets = [0, 64], sizes = [8, 32], strides = [1, 1]} : vector<8x96xf32> to vector<8x32xf32>
    %195 = math.tanh %193 : vector<8x32xf32>
    %196 = arith.mulf %194, %195 : vector<8x32xf32>
    %197 = vector.extract_strided_slice %175 {offsets = [8, 0], sizes = [8, 128], strides = [1, 1]} : vector<64x128xf32> to vector<8x128xf32>
    %cst_47 = arith.constant dense<0.000000e+00> : vector<8x128xf32>
    %198 = tpu.matmul %196, %171, %cst_47 {dimension_numbers = #tpu.dot_dimension_numbers<[1], [0], [0], [1], [0, 0, 1, 1], [], []>} : vector<8x32xf32>, vector<32x128xf32>, vector<8x128xf32> -> vector<8x128xf32>
    %199 = arith.addf %197, %198 : vector<8x128xf32>
    %200 = vector.extract_strided_slice %199 {offsets = [0, 0], sizes = [8, 96], strides = [1, 1]} : vector<8x128xf32> to vector<8x96xf32>
    %201 = arith.negf %200 : vector<8x96xf32>
    %202 = math.exp %201 : vector<8x96xf32>
    %cst_48 = arith.constant 1.000000e+00 : f32
    %203 = vector.broadcast %cst_48 : f32 to vector<8x96xf32>
    %204 = arith.addf %203, %202 : vector<8x96xf32>
    %205 = arith.divf %203, %204 : vector<8x96xf32>
    %206 = vector.extract_strided_slice %199 {offsets = [0, 96], sizes = [8, 32], strides = [1, 1]} : vector<8x128xf32> to vector<8x32xf32>
    %207 = math.tanh %206 : vector<8x32xf32>
    %208 = vector.extract_strided_slice %205 {offsets = [0, 32], sizes = [8, 32], strides = [1, 1]} : vector<8x96xf32> to vector<8x32xf32>
    %209 = arith.mulf %208, %193 : vector<8x32xf32>
    %210 = vector.extract_strided_slice %205 {offsets = [0, 0], sizes = [8, 32], strides = [1, 1]} : vector<8x96xf32> to vector<8x32xf32>
    %211 = arith.mulf %210, %207 : vector<8x32xf32>
    %212 = arith.addf %209, %211 : vector<8x32xf32>
    %213 = vector.extract_strided_slice %205 {offsets = [0, 64], sizes = [8, 32], strides = [1, 1]} : vector<8x96xf32> to vector<8x32xf32>
    %214 = math.tanh %212 : vector<8x32xf32>
    %215 = arith.mulf %213, %214 : vector<8x32xf32>
    %216 = vector.extract_strided_slice %175 {offsets = [16, 0], sizes = [8, 128], strides = [1, 1]} : vector<64x128xf32> to vector<8x128xf32>
    %cst_49 = arith.constant dense<0.000000e+00> : vector<8x128xf32>
    %217 = tpu.matmul %215, %171, %cst_49 {dimension_numbers = #tpu.dot_dimension_numbers<[1], [0], [0], [1], [0, 0, 1, 1], [], []>} : vector<8x32xf32>, vector<32x128xf32>, vector<8x128xf32> -> vector<8x128xf32>
    %218 = arith.addf %216, %217 : vector<8x128xf32>
    %219 = vector.extract_strided_slice %218 {offsets = [0, 0], sizes = [8, 96], strides = [1, 1]} : vector<8x128xf32> to vector<8x96xf32>
    %220 = arith.negf %219 : vector<8x96xf32>
    %221 = math.exp %220 : vector<8x96xf32>
    %cst_50 = arith.constant 1.000000e+00 : f32
    %222 = vector.broadcast %cst_50 : f32 to vector<8x96xf32>
    %223 = arith.addf %222, %221 : vector<8x96xf32>
    %224 = arith.divf %222, %223 : vector<8x96xf32>
    %225 = vector.extract_strided_slice %218 {offsets = [0, 96], sizes = [8, 32], strides = [1, 1]} : vector<8x128xf32> to vector<8x32xf32>
    %226 = math.tanh %225 : vector<8x32xf32>
    %227 = vector.extract_strided_slice %224 {offsets = [0, 32], sizes = [8, 32], strides = [1, 1]} : vector<8x96xf32> to vector<8x32xf32>
    %228 = arith.mulf %227, %212 : vector<8x32xf32>
    %229 = vector.extract_strided_slice %224 {offsets = [0, 0], sizes = [8, 32], strides = [1, 1]} : vector<8x96xf32> to vector<8x32xf32>
    %230 = arith.mulf %229, %226 : vector<8x32xf32>
    %231 = arith.addf %228, %230 : vector<8x32xf32>
    %232 = vector.extract_strided_slice %224 {offsets = [0, 64], sizes = [8, 32], strides = [1, 1]} : vector<8x96xf32> to vector<8x32xf32>
    %233 = math.tanh %231 : vector<8x32xf32>
    %234 = arith.mulf %232, %233 : vector<8x32xf32>
    %235 = vector.extract_strided_slice %175 {offsets = [24, 0], sizes = [8, 128], strides = [1, 1]} : vector<64x128xf32> to vector<8x128xf32>
    %cst_51 = arith.constant dense<0.000000e+00> : vector<8x128xf32>
    %236 = tpu.matmul %234, %171, %cst_51 {dimension_numbers = #tpu.dot_dimension_numbers<[1], [0], [0], [1], [0, 0, 1, 1], [], []>} : vector<8x32xf32>, vector<32x128xf32>, vector<8x128xf32> -> vector<8x128xf32>
    %237 = arith.addf %235, %236 : vector<8x128xf32>
    %238 = vector.extract_strided_slice %237 {offsets = [0, 0], sizes = [8, 96], strides = [1, 1]} : vector<8x128xf32> to vector<8x96xf32>
    %239 = arith.negf %238 : vector<8x96xf32>
    %240 = math.exp %239 : vector<8x96xf32>
    %cst_52 = arith.constant 1.000000e+00 : f32
    %241 = vector.broadcast %cst_52 : f32 to vector<8x96xf32>
    %242 = arith.addf %241, %240 : vector<8x96xf32>
    %243 = arith.divf %241, %242 : vector<8x96xf32>
    %244 = vector.extract_strided_slice %237 {offsets = [0, 96], sizes = [8, 32], strides = [1, 1]} : vector<8x128xf32> to vector<8x32xf32>
    %245 = math.tanh %244 : vector<8x32xf32>
    %246 = vector.extract_strided_slice %243 {offsets = [0, 32], sizes = [8, 32], strides = [1, 1]} : vector<8x96xf32> to vector<8x32xf32>
    %247 = arith.mulf %246, %231 : vector<8x32xf32>
    %248 = vector.extract_strided_slice %243 {offsets = [0, 0], sizes = [8, 32], strides = [1, 1]} : vector<8x96xf32> to vector<8x32xf32>
    %249 = arith.mulf %248, %245 : vector<8x32xf32>
    %250 = arith.addf %247, %249 : vector<8x32xf32>
    %251 = vector.extract_strided_slice %243 {offsets = [0, 64], sizes = [8, 32], strides = [1, 1]} : vector<8x96xf32> to vector<8x32xf32>
    %252 = math.tanh %250 : vector<8x32xf32>
    %253 = arith.mulf %251, %252 : vector<8x32xf32>
    %254 = vector.extract_strided_slice %175 {offsets = [32, 0], sizes = [8, 128], strides = [1, 1]} : vector<64x128xf32> to vector<8x128xf32>
    %cst_53 = arith.constant dense<0.000000e+00> : vector<8x128xf32>
    %255 = tpu.matmul %253, %171, %cst_53 {dimension_numbers = #tpu.dot_dimension_numbers<[1], [0], [0], [1], [0, 0, 1, 1], [], []>} : vector<8x32xf32>, vector<32x128xf32>, vector<8x128xf32> -> vector<8x128xf32>
    %256 = arith.addf %254, %255 : vector<8x128xf32>
    %257 = vector.extract_strided_slice %256 {offsets = [0, 0], sizes = [8, 96], strides = [1, 1]} : vector<8x128xf32> to vector<8x96xf32>
    %258 = arith.negf %257 : vector<8x96xf32>
    %259 = math.exp %258 : vector<8x96xf32>
    %cst_54 = arith.constant 1.000000e+00 : f32
    %260 = vector.broadcast %cst_54 : f32 to vector<8x96xf32>
    %261 = arith.addf %260, %259 : vector<8x96xf32>
    %262 = arith.divf %260, %261 : vector<8x96xf32>
    %263 = vector.extract_strided_slice %256 {offsets = [0, 96], sizes = [8, 32], strides = [1, 1]} : vector<8x128xf32> to vector<8x32xf32>
    %264 = math.tanh %263 : vector<8x32xf32>
    %265 = vector.extract_strided_slice %262 {offsets = [0, 32], sizes = [8, 32], strides = [1, 1]} : vector<8x96xf32> to vector<8x32xf32>
    %266 = arith.mulf %265, %250 : vector<8x32xf32>
    %267 = vector.extract_strided_slice %262 {offsets = [0, 0], sizes = [8, 32], strides = [1, 1]} : vector<8x96xf32> to vector<8x32xf32>
    %268 = arith.mulf %267, %264 : vector<8x32xf32>
    %269 = arith.addf %266, %268 : vector<8x32xf32>
    %270 = vector.extract_strided_slice %262 {offsets = [0, 64], sizes = [8, 32], strides = [1, 1]} : vector<8x96xf32> to vector<8x32xf32>
    %271 = math.tanh %269 : vector<8x32xf32>
    %272 = arith.mulf %270, %271 : vector<8x32xf32>
    %273 = vector.extract_strided_slice %175 {offsets = [40, 0], sizes = [8, 128], strides = [1, 1]} : vector<64x128xf32> to vector<8x128xf32>
    %cst_55 = arith.constant dense<0.000000e+00> : vector<8x128xf32>
    %274 = tpu.matmul %272, %171, %cst_55 {dimension_numbers = #tpu.dot_dimension_numbers<[1], [0], [0], [1], [0, 0, 1, 1], [], []>} : vector<8x32xf32>, vector<32x128xf32>, vector<8x128xf32> -> vector<8x128xf32>
    %275 = arith.addf %273, %274 : vector<8x128xf32>
    %276 = vector.extract_strided_slice %275 {offsets = [0, 0], sizes = [8, 96], strides = [1, 1]} : vector<8x128xf32> to vector<8x96xf32>
    %277 = arith.negf %276 : vector<8x96xf32>
    %278 = math.exp %277 : vector<8x96xf32>
    %cst_56 = arith.constant 1.000000e+00 : f32
    %279 = vector.broadcast %cst_56 : f32 to vector<8x96xf32>
    %280 = arith.addf %279, %278 : vector<8x96xf32>
    %281 = arith.divf %279, %280 : vector<8x96xf32>
    %282 = vector.extract_strided_slice %275 {offsets = [0, 96], sizes = [8, 32], strides = [1, 1]} : vector<8x128xf32> to vector<8x32xf32>
    %283 = math.tanh %282 : vector<8x32xf32>
    %284 = vector.extract_strided_slice %281 {offsets = [0, 32], sizes = [8, 32], strides = [1, 1]} : vector<8x96xf32> to vector<8x32xf32>
    %285 = arith.mulf %284, %269 : vector<8x32xf32>
    %286 = vector.extract_strided_slice %281 {offsets = [0, 0], sizes = [8, 32], strides = [1, 1]} : vector<8x96xf32> to vector<8x32xf32>
    %287 = arith.mulf %286, %283 : vector<8x32xf32>
    %288 = arith.addf %285, %287 : vector<8x32xf32>
    %289 = vector.extract_strided_slice %281 {offsets = [0, 64], sizes = [8, 32], strides = [1, 1]} : vector<8x96xf32> to vector<8x32xf32>
    %290 = math.tanh %288 : vector<8x32xf32>
    %291 = arith.mulf %289, %290 : vector<8x32xf32>
    %292 = vector.extract_strided_slice %175 {offsets = [48, 0], sizes = [8, 128], strides = [1, 1]} : vector<64x128xf32> to vector<8x128xf32>
    %cst_57 = arith.constant dense<0.000000e+00> : vector<8x128xf32>
    %293 = tpu.matmul %291, %171, %cst_57 {dimension_numbers = #tpu.dot_dimension_numbers<[1], [0], [0], [1], [0, 0, 1, 1], [], []>} : vector<8x32xf32>, vector<32x128xf32>, vector<8x128xf32> -> vector<8x128xf32>
    %294 = arith.addf %292, %293 : vector<8x128xf32>
    %295 = vector.extract_strided_slice %294 {offsets = [0, 0], sizes = [8, 96], strides = [1, 1]} : vector<8x128xf32> to vector<8x96xf32>
    %296 = arith.negf %295 : vector<8x96xf32>
    %297 = math.exp %296 : vector<8x96xf32>
    %cst_58 = arith.constant 1.000000e+00 : f32
    %298 = vector.broadcast %cst_58 : f32 to vector<8x96xf32>
    %299 = arith.addf %298, %297 : vector<8x96xf32>
    %300 = arith.divf %298, %299 : vector<8x96xf32>
    %301 = vector.extract_strided_slice %294 {offsets = [0, 96], sizes = [8, 32], strides = [1, 1]} : vector<8x128xf32> to vector<8x32xf32>
    %302 = math.tanh %301 : vector<8x32xf32>
    %303 = vector.extract_strided_slice %300 {offsets = [0, 32], sizes = [8, 32], strides = [1, 1]} : vector<8x96xf32> to vector<8x32xf32>
    %304 = arith.mulf %303, %288 : vector<8x32xf32>
    %305 = vector.extract_strided_slice %300 {offsets = [0, 0], sizes = [8, 32], strides = [1, 1]} : vector<8x96xf32> to vector<8x32xf32>
    %306 = arith.mulf %305, %302 : vector<8x32xf32>
    %307 = arith.addf %304, %306 : vector<8x32xf32>
    %308 = vector.extract_strided_slice %300 {offsets = [0, 64], sizes = [8, 32], strides = [1, 1]} : vector<8x96xf32> to vector<8x32xf32>
    %309 = math.tanh %307 : vector<8x32xf32>
    %310 = arith.mulf %308, %309 : vector<8x32xf32>
    %311 = vector.extract_strided_slice %175 {offsets = [56, 0], sizes = [8, 128], strides = [1, 1]} : vector<64x128xf32> to vector<8x128xf32>
    %cst_59 = arith.constant dense<0.000000e+00> : vector<8x128xf32>
    %312 = tpu.matmul %310, %171, %cst_59 {dimension_numbers = #tpu.dot_dimension_numbers<[1], [0], [0], [1], [0, 0, 1, 1], [], []>} : vector<8x32xf32>, vector<32x128xf32>, vector<8x128xf32> -> vector<8x128xf32>
    %313 = arith.addf %311, %312 : vector<8x128xf32>
    %314 = vector.extract_strided_slice %313 {offsets = [0, 0], sizes = [8, 96], strides = [1, 1]} : vector<8x128xf32> to vector<8x96xf32>
    %315 = arith.negf %314 : vector<8x96xf32>
    %316 = math.exp %315 : vector<8x96xf32>
    %cst_60 = arith.constant 1.000000e+00 : f32
    %317 = vector.broadcast %cst_60 : f32 to vector<8x96xf32>
    %318 = arith.addf %317, %316 : vector<8x96xf32>
    %319 = arith.divf %317, %318 : vector<8x96xf32>
    %320 = vector.extract_strided_slice %313 {offsets = [0, 96], sizes = [8, 32], strides = [1, 1]} : vector<8x128xf32> to vector<8x32xf32>
    %321 = math.tanh %320 : vector<8x32xf32>
    %322 = vector.extract_strided_slice %319 {offsets = [0, 32], sizes = [8, 32], strides = [1, 1]} : vector<8x96xf32> to vector<8x32xf32>
    %323 = arith.mulf %322, %307 : vector<8x32xf32>
    %324 = vector.extract_strided_slice %319 {offsets = [0, 0], sizes = [8, 32], strides = [1, 1]} : vector<8x96xf32> to vector<8x32xf32>
    %325 = arith.mulf %324, %321 : vector<8x32xf32>
    %326 = arith.addf %323, %325 : vector<8x32xf32>
    %327 = vector.extract_strided_slice %319 {offsets = [0, 64], sizes = [8, 32], strides = [1, 1]} : vector<8x96xf32> to vector<8x32xf32>
    %328 = math.tanh %326 : vector<8x32xf32>
    %329 = arith.mulf %327, %328 : vector<8x32xf32>
    %c0_61 = arith.constant 0 : index
    %c0_62 = arith.constant 0 : index
    %330 = vector.load %arg7[%c0_61, %c0_62] : memref<32x32xf32, #tpu.memory_space<vmem>>, vector<32x32xf32>
    %cst_63 = arith.constant dense<0.000000e+00> : vector<8x32xf32>
    %331 = tpu.matmul %329, %330, %cst_63 {dimension_numbers = #tpu.dot_dimension_numbers<[1], [0], [0], [1], [0, 0, 1, 1], [], []>} : vector<8x32xf32>, vector<32x32xf32>, vector<8x32xf32> -> vector<8x32xf32>
    %c0_64 = arith.constant 0 : index
    %c0_65 = arith.constant 0 : index
    %332 = vector.load %arg8[%c0_64, %c0_65] : memref<1x32xf32, #tpu.memory_space<vmem>>, vector<1x32xf32>
    %333 = vector.broadcast %332 : vector<1x32xf32> to vector<8x32xf32>
    %334 = arith.addf %331, %333 : vector<8x32xf32>
    %cst_66 = arith.constant 0.000000e+00 : f32
    %335 = vector.broadcast %cst_66 : f32 to vector<8x32xf32>
    %336 = arith.maximumf %334, %335 : vector<8x32xf32>
    %c0_67 = arith.constant 0 : index
    %c0_68 = arith.constant 0 : index
    %337 = vector.load %arg9[%c0_67, %c0_68] : memref<32x4xf32, #tpu.memory_space<vmem>>, vector<32x4xf32>
    %cst_69 = arith.constant dense<0.000000e+00> : vector<8x4xf32>
    %338 = tpu.matmul %336, %337, %cst_69 {dimension_numbers = #tpu.dot_dimension_numbers<[1], [0], [0], [1], [0, 0, 1, 1], [], []>} : vector<8x32xf32>, vector<32x4xf32>, vector<8x4xf32> -> vector<8x4xf32>
    %c0_70 = arith.constant 0 : index
    %c0_71 = arith.constant 0 : index
    %339 = vector.load %arg10[%c0_70, %c0_71] : memref<1x4xf32, #tpu.memory_space<vmem>>, vector<1x4xf32>
    %340 = vector.broadcast %339 : vector<1x4xf32> to vector<8x4xf32>
    %341 = arith.addf %338, %340 : vector<8x4xf32>
    %c0_72 = arith.constant 0 : index
    %c0_73 = arith.constant 0 : index
    %342 = vector.load %arg11[%c0_72, %c0_73] : memref<8x4xf32, #tpu.memory_space<vmem>>, vector<8x4xf32>
    tpu.vector_store %arg11[%c0_72, %c0_73], %341 {strides = array<i32>} : memref<8x4xf32, #tpu.memory_space<vmem>>, vector<8x4xf32>,
    return
  }
}

</mosaic_0001>

<bundles_post_ra>
// kernel: my_lstm_with_softmax_forward.1
= control target key start
LH: loop header
LB: loop body
LE: loop exit
PB: predicated region body
PF: predicated region fallthrough
CT: control target
= control target key end

     0   :  { %vm56_vm0 = vcmask 130048   ;;  %v1483_v7 = vmov 0.0   ;;  %s1484_s12 = smov 32   ;;  %s1485_s13 = smov 64   ;;  %vm122_vm5 = vcmask 261120   ;;  %s1886_s2 = inlined_call_operand.vmem [shape: f32[32,128], index: 2, kind: input, shape index: {}]   ;;  %s1887_s1 = inlined_call_operand.vmem [shape: f32[16,128], index: 1, kind: input, shape index: {}]   ;;  %s1888_s0 = inlined_call_operand.vmem [shape: f32[64,16], index: 0, kind: input, shape index: {}]   ;;  %s1889_s3 = inlined_call_operand.vmem [shape: f32[1,128], index: 3, kind: input, shape index: {}]   ;;  %s1890_s4 = inlined_call_operand.vmem [shape: f32[32,128], index: 4, kind: input, shape index: {}]   ;;  %s1891_s6 = inlined_call_operand.vmem [shape: f32[1,128], index: 6, kind: input, shape index: {}]   ;;  %s1892_s5 = inlined_call_operand.vmem [shape: f32[32,128], index: 5, kind: input, shape index: {}]   ;;  %s1893_s7 = inlined_call_operand.vmem [shape: f32[32,32], index: 7, kind: input, shape index: {}]   ;;  %s1894_s8 = inlined_call_operand.vmem [shape: f32[1,32], index: 8, kind: input, shape index: {}]   ;;  %s1895_s9 = inlined_call_operand.vmem [shape: f32[32,4], index: 9, kind: input, shape index: {}]   ;;  %s1896_s10 = inlined_call_operand.vmem [shape: f32[1,4], index: 10, kind: input, shape index: {}]   ;;  %s1897_s11 = inlined_call_operand.vmem [shape: f32[8,4], index: 11, kind: output, shape index: {}]  }
   0x1   :  { %v1549_v0 = vld [vmem:[%s1886_s2 + $0x18] sm:$0xff]  ;;  %v47_v1 = vld [vmem:[%s1887_s1 + $0x8] sm:$0xff]  ;;  %v1557_v2 = vld [vmem:[%s1886_s2 + $0x10] sm:$0xff] }
   0x2   :  { %138 = vmatpush.msra.mxu1 %v1549_v0  ;;  %95 = vmatpush.msra.mxu0 %v47_v1  ;;  %v46_v3 = vld [vmem:[%s1887_s1] sm:$0xff]  ;;  %v1569_v5 = vld [vmem:[%s1886_s2 + $0x8] sm:$0xff]  ;;  %v40_v61 = vld [vmem:[%s1888_s0 + $0x10] sm:$0xff] }
   0x3   :  { %v38_v4 = vld [vmem:[%s1888_s0] sm:$0xff]  ;;  %203 = vmatpush.msra.mxu2 %v1549_v0  ;;  %463 = vmatpush.msra.mxu3 %v1549_v0  ;;  %v39_v35 = vld [vmem:[%s1888_s0 + $0x8] sm:$0xff]  ;;  %v41_v62 = vld [vmem:[%s1888_s0 + $0x18] sm:$0xff] }
   0x4   :  { %139 = vmatpush.msra.mxu1 %v1557_v2  ;;  %96 = vmatpush.msra.mxu0 %v46_v3  ;;  %v1578_v6 = vld [vmem:[%s1886_s2] sm:$0xff]  ;;  %v44_v3 = vld [vmem:[%s1888_s0 + $0x30] sm:$0xff] }
   0x5   :  { %1299 = vmatmul.msk.f32.vlgmr.msra.gmra.mxu0 %vm56_vm0, %v38_v4  ;;  %204 = vmatpush.msra.mxu2 %v1557_v2  ;;  %v1608_v8 = vld [vmem:[%s1889_s3] ss:$0 sm:$0xff]  ;;  %v45_v4 = vld [vmem:[%s1888_s0 + $0x38] sm:$0xff] }
   0x6   :  { %140 = vmatpush.msra.mxu1 %v1569_v5  ;;  %268 = vmatpush.msrb.mxu0 %v1549_v0  ;;  %v42_v63 = vld [vmem:[%s1888_s0 + $0x20] sm:$0xff] }
   0x7   :  { %205 = vmatpush.msra.mxu2 %v1569_v5  ;;  %464 = vmatpush.msra.mxu3 %v1557_v2 }
   0x8   :  { %141 = vmatpush.msra.mxu1 %v1578_v6  ;;  %269 = vmatpush.msrb.mxu0 %v1557_v2 }
   0x9   :  { %142 = vmatmul.f32.vlgmr.msra.gmra.mxu1 %v1483_v7  ;;  %206 = vmatpush.msra.mxu2 %v1578_v6 }
   0xa   :  { %270 = vmatpush.msrb.mxu0 %v1569_v5  ;;  %333 = vmatpush.msrb.mxu1 %v1549_v0 }
   0xb   :  { %398 = vmatpush.msrb.mxu2 %v1549_v0  ;;  %465 = vmatpush.msra.mxu3 %v1569_v5 }
   0xc   :  { %271 = vmatpush.msrb.mxu0 %v1578_v6  ;;  %334 = vmatpush.msrb.mxu1 %v1557_v2 }
   0xd   :  { %399 = vmatpush.msrb.mxu2 %v1557_v2  ;;  %466 = vmatpush.msra.mxu3 %v1578_v6 }
   0xe   :  { %335 = vmatpush.msrb.mxu1 %v1569_v5  ;;  %1300 = vmatmul.msk.f32.gmra.mxu0 %vm56_vm0, %v39_v35 }
   0xf   :  { %400 = vmatpush.msrb.mxu2 %v1569_v5 }
  0x10   :  { %336 = vmatpush.msrb.mxu1 %v1578_v6 }
  0x11   :  { %401 = vmatpush.msrb.mxu2 %v1578_v6 }
  0x12   :  { %528 = vmatpush.msra.mxu1 %v1549_v0 }
  0x14   :  { %529 = vmatpush.msra.mxu1 %v1557_v2 }
  0x16   :  { %530 = vmatpush.msra.mxu1 %v1569_v5  ;;  %1301 = vmatmul.msk.f32.gmra.mxu0 %vm56_vm0, %v40_v61 }
  0x18   :  { %531 = vmatpush.msra.mxu1 %v1578_v6 }
  0x1e   :  { %1302 = vmatmul.msk.f32.gmra.mxu0 %vm56_vm0, %v41_v62 }
  0x26   :  { %1303 = vmatmul.msk.f32.gmra.mxu0 %vm56_vm0, %v42_v63 }
  0x82   :  { %v98_v9 = vpop.f32.mrf.mxu0 }
  0x83   :  { %v99_v10 = vadd.f32 %v1608_v8, %v98_v9 }
  0x86   :  { %v143_v11 = vpop.f32.mrf.mxu1 }
  0x87   :  { %v146_v12 = vadd.f32 %v143_v11, %v99_v10 }
  0x89   :  { %1354 = vtanh.f32 %v146_v12  ;;  %v1307_v14 = vmul.f32 -1.442695, %v146_v12 }
  0x8b   :  { %1356 = vpow2.f32 %v1307_v14  ;;  %v101_v37 = vpop.f32.mrf.mxu0 }
  0x8c   :  { %v102_v38 = vadd.f32 %v1608_v8, %v101_v37 }
  0x8f   :  { %v1355_v13 = vpop.eup %1354 }
  0x90   :  { %169 = vrot.lane.b32.xlu0 %v1355_v13, %s1484_s12 }
  0x91   :  { %v1357_v15 = vpop.eup %1356 }
  0x92   :  { %v150_v16 = vadd.f32 1.0, %v1357_v15 }
  0x94   :  { %1358 = vrcp.f32 %v150_v16  ;;  %v162_v22 = vand.u32 2147483648, %v150_v16  ;;  %vm156_vm2 = vweird.f32 %v150_v16  ;;  %v160_v23 = vand.u32 2147483647, %v150_v16 }
  0x96   :  { %v163_v25 = vor.u32 1.1754944e-38, %v162_v22  ;;  %vm161_vm4 = vcmp.eq.f32.partialorder %v160_v23, 8.507059e+37 }
  0x9a   :  { %v1359_v17 = vpop.eup %1358 }
  0x9b   :  { %v152_v18 = vmul.f32 %v1359_v17, %v150_v16  ;;  %vm157_vm1 = vweird.f32 %v1359_v17 }
  0x9c   :  { %vm158_vm3 = vmor %vm156_vm2, %vm157_vm1 }
  0x9d   :  { %v153_v19 = vsub.f32 1.0, %v152_v18 }
  0x9f   :  { %v154_v20 = vmul.f32 %v1359_v17, %v153_v19 }
  0xa1   :  { %v155_v21 = vadd.f32 %v1359_v17, %v154_v20 }
  0xa3   :  { %v159_v24 = vsel %vm158_vm3, %v1359_v17, %v155_v21 }
  0xa4   :  { %v164_v27 = vsel %vm161_vm4, %v163_v25, %v159_v24 }
  0xa5   :  { %v167_v29 = vmul.f32 0.0, %v164_v27 }
 0x102   :  { %v170_v26 = vpop.permute.xlu0 %169 }
 0x103   :  { %v172_v28 = vmul.f32 %v170_v26, %v164_v27 }
 0x105   :  { %174 = vrot.lane.b32.xlu0 %v172_v28, %s1484_s12 }
 0x177   :  { %v175_v30 = vpop.permute.xlu0 %174 }
 0x178   :  { %v177_v31 = vadd.f32 %v175_v30, %v167_v29 }
 0x17a   :  { %1360 = vtanh.f32 %v177_v31 }
 0x180   :  { %v1361_v32 = vpop.eup %1360 }
 0x181   :  { %180 = vrot.lane.b32.xlu1 %v1361_v32, %s1484_s12 }
 0x1f3   :  { %v181_v33 = vpop.permute.xlu1 %180 }
 0x1f4   :  { %v183_v34 = vmul.f32 %v181_v33, %v164_v27 }
 0x1f6   :  { %185 = vrot.lane.b32.xlu1 %v183_v34, %s1485_s13 }
 0x268   :  { %v186_v36 = vpop.permute.xlu1 %185 }
 0x269   :  { %188 = vst.msk [vmem:[#allocation2] sm:$0xff] %vm122_vm5, %v186_v36  ;;  %1308 = vmatmul.msk.f32.vlgmr.msra.gmra.mxu2 %vm122_vm5, %v186_v36 }
 0x26a   :  { %593 = vmatpush.msra.mxu2 %v1549_v0  ;;  %v43_v0 = vld [vmem:[%s1888_s0 + $0x28] sm:$0xff] }
 0x26b   :  { %1304 = vmatmul.msk.f32.gmra.mxu0 %vm56_vm0, %v43_v0 }
 0x26c   :  { %594 = vmatpush.msra.mxu2 %v1557_v2 }
 0x26e   :  { %595 = vmatpush.msra.mxu2 %v1569_v5 }
 0x270   :  { %596 = vmatpush.msra.mxu2 %v1578_v6  ;;  %v104_v6 = vpop.f32.mrf.mxu0 }
 0x271   :  { %v105_v14 = vadd.f32 %v1608_v8, %v104_v6 }
 0x273   :  { %1305 = vmatmul.msk.f32.gmra.mxu0 %vm56_vm0, %v44_v3 }
 0x278   :  { %v107_v9 = vpop.f32.mrf.mxu0 }
 0x27b   :  { %1306 = vmatmul.msk.f32.gmra.mxu0 %vm56_vm0, %v45_v4 }
 0x280   :  { %v1656_v10 = vpop.f32.mrf.mxu0 }
 0x2e8   :  { %v1658_v11 = vpop.f32.mrf.mxu0 }
 0x2ec   :  { %v208_v39 = vpop.f32.mrf.mxu2 }
 0x2ed   :  { %v211_v40 = vadd.f32 %v208_v39, %v102_v38 }
 0x2ef   :  { %1362 = vtanh.f32 %v211_v40  ;;  %v1309_v42 = vmul.f32 -1.442695, %v211_v40  ;;  %v108_v40 = vadd.f32 %v1608_v8, %v107_v9 }
 0x2f0   :  { %v1660_v12 = vpop.f32.mrf.mxu0 }
 0x2f1   :  { %1364 = vpow2.f32 %v1309_v42 }
 0x2f5   :  { %v1363_v41 = vpop.eup %1362 }
 0x2f6   :  { %234 = vrot.lane.b32.xlu2 %v1363_v41, %s1484_s12 }
 0x2f7   :  { %v1365_v43 = vpop.eup %1364 }
 0x2f8   :  { %v215_v44 = vadd.f32 1.0, %v1365_v43  ;;  %v1662_v13 = vpop.f32.mrf.mxu0 }
 0x2fa   :  { %1366 = vrcp.f32 %v215_v44  ;;  %v227_v50 = vand.u32 2147483648, %v215_v44  ;;  %vm221_vm7 = vweird.f32 %v215_v44  ;;  %v225_v51 = vand.u32 2147483647, %v215_v44 }
 0x2fc   :  { %v228_v53 = vor.u32 1.1754944e-38, %v227_v50  ;;  %vm226_vm9 = vcmp.eq.f32.partialorder %v225_v51, 8.507059e+37 }
 0x300   :  { %v1367_v45 = vpop.eup %1366 }
 0x301   :  { %v217_v46 = vmul.f32 %v1367_v45, %v215_v44  ;;  %vm222_vm6 = vweird.f32 %v1367_v45 }
 0x302   :  { %vm223_vm8 = vmor %vm221_vm7, %vm222_vm6 }
 0x303   :  { %v218_v47 = vsub.f32 1.0, %v217_v46 }
 0x305   :  { %v219_v48 = vmul.f32 %v1367_v45, %v218_v47 }
 0x307   :  { %v220_v49 = vadd.f32 %v1367_v45, %v219_v48 }
 0x309   :  { %v224_v52 = vsel %vm223_vm8, %v1367_v45, %v220_v49 }
 0x30a   :  { %v229_v55 = vsel %vm226_vm9, %v228_v53, %v224_v52 }
 0x30b   :  { %v232_v57 = vmul.f32 %v229_v55, %v177_v31 }
 0x350   :  { %v235_v54 = vpop.permute.xlu2 %234 }
 0x351   :  { %v237_v56 = vmul.f32 %v235_v54, %v229_v55 }
 0x353   :  { %239 = vrot.lane.b32.xlu2 %v237_v56, %s1484_s12 }
 0x3ad   :  { %v240_v58 = vpop.permute.xlu2 %239 }
 0x3ae   :  { %v242_v59 = vadd.f32 %v240_v58, %v232_v57 }
 0x3b0   :  { %1368 = vtanh.f32 %v242_v59 }
 0x3b6   :  { %v1369_v60 = vpop.eup %1368 }
 0x3b7   :  { %245 = vrot.lane.b32.xlu0 %v1369_v60, %s1484_s12 }
 0x429   :  { %v246_v1 = vpop.permute.xlu0 %245 }
 0x42a   :  { %v248_v2 = vmul.f32 %v246_v1, %v229_v55 }
 0x42c   :  { %250 = vrot.lane.b32.xlu1 %v248_v2, %s1485_s13  ;;  %v111_v2 = vadd.f32 %v1608_v8, %v1656_v10 }
 0x49e   :  { %v251_v5 = vpop.permute.xlu1 %250 }
 0x49f   :  { %253 = vst.msk [vmem:[#allocation2 + $0x8] sm:$0xff] %vm122_vm5, %v251_v5  ;;  %1310 = vmatmul.msk.f32.vlgmr.msrb.gmra.mxu0 %vm122_vm5, %v251_v5 }
 0x51c   :  { %v273_v15 = vpop.f32.mrf.mxu0 }
 0x51d   :  { %v276_v16 = vadd.f32 %v273_v15, %v105_v14 }
 0x51f   :  { %1370 = vtanh.f32 %v276_v16  ;;  %v1311_v18 = vmul.f32 -1.442695, %v276_v16 }
 0x521   :  { %1372 = vpow2.f32 %v1311_v18 }
 0x525   :  { %v1371_v17 = vpop.eup %1370 }
 0x526   :  { %299 = vrot.lane.b32.xlu2 %v1371_v17, %s1484_s12 }
 0x527   :  { %v1373_v19 = vpop.eup %1372 }
 0x528   :  { %v280_v20 = vadd.f32 1.0, %v1373_v19 }
 0x52a   :  { %1374 = vrcp.f32 %v280_v20  ;;  %v292_v26 = vand.u32 2147483648, %v280_v20  ;;  %vm286_vm11 = vweird.f32 %v280_v20  ;;  %v290_v27 = vand.u32 2147483647, %v280_v20 }
 0x52c   :  { %v293_v29 = vor.u32 1.1754944e-38, %v292_v26  ;;  %vm291_vm13 = vcmp.eq.f32.partialorder %v290_v27, 8.507059e+37 }
 0x530   :  { %v1375_v21 = vpop.eup %1374 }
 0x531   :  { %v282_v22 = vmul.f32 %v1375_v21, %v280_v20  ;;  %vm287_vm10 = vweird.f32 %v1375_v21 }
 0x532   :  { %vm288_vm12 = vmor %vm286_vm11, %vm287_vm10 }
 0x533   :  { %v283_v23 = vsub.f32 1.0, %v282_v22 }
 0x535   :  { %v284_v24 = vmul.f32 %v1375_v21, %v283_v23 }
 0x537   :  { %v285_v25 = vadd.f32 %v1375_v21, %v284_v24 }
 0x539   :  { %v289_v28 = vsel %vm288_vm12, %v1375_v21, %v285_v25 }
 0x53a   :  { %v294_v31 = vsel %vm291_vm13, %v293_v29, %v289_v28 }
 0x53b   :  { %v297_v33 = vmul.f32 %v294_v31, %v242_v59 }
 0x580   :  { %v300_v30 = vpop.permute.xlu2 %299 }
 0x581   :  { %v302_v32 = vmul.f32 %v300_v30, %v294_v31 }
 0x583   :  { %304 = vrot.lane.b32.xlu0 %v302_v32, %s1484_s12  ;;  %v655_v32 = vld [vmem:[%s1890_s4 + $0x18] sm:$0xff] }
 0x584   :  { %700 = vmatpush.msrb.mxu3 %v655_v32 }
 0x5f5   :  { %v305_v34 = vpop.permute.xlu0 %304 }
 0x5f6   :  { %v307_v35 = vadd.f32 %v305_v34, %v297_v33  ;;  %v654_v33 = vld [vmem:[%s1890_s4 + $0x10] sm:$0xff]  ;;  %v653_v34 = vld [vmem:[%s1890_s4 + $0x8] sm:$0xff] }
 0x5f7   :  { %701 = vmatpush.msrb.mxu3 %v654_v33 }
 0x5f8   :  { %1376 = vtanh.f32 %v307_v35 }
 0x5f9   :  { %702 = vmatpush.msrb.mxu3 %v653_v34 }
 0x5fe   :  { %v1377_v36 = vpop.eup %1376 }
 0x5ff   :  { %310 = vrot.lane.b32.xlu1 %v1377_v36, %s1484_s12 }
 0x671   :  { %v311_v37 = vpop.permute.xlu1 %310 }
 0x672   :  { %v313_v38 = vmul.f32 %v311_v37, %v294_v31  ;;  %v644_v37 = vld [vmem:[#allocation2] sm:$0xff] }
 0x674   :  { %315 = vrot.lane.b32.xlu2 %v313_v38, %s1485_s13  ;;  %v645_v38 = vld [vmem:[#allocation2 + $0x8] sm:$0xff] }
 0x6ce   :  { %v316_v39 = vpop.permute.xlu2 %315 }
 0x6cf   :  { %318 = vst.msk [vmem:[#allocation2 + $0x10] sm:$0xff] %vm122_vm5, %v316_v39  ;;  %1312 = vmatmul.msk.f32.vlgmr.msrb.gmra.mxu1 %vm122_vm5, %v316_v39 }
 0x6d6   :  { %v646_v39 = vld [vmem:[#allocation2 + $0x10] sm:$0xff] }
 0x74c   :  { %v338_v41 = vpop.f32.mrf.mxu1 }
 0x74d   :  { %v341_v42 = vadd.f32 %v338_v41, %v108_v40 }
 0x74f   :  { %1378 = vtanh.f32 %v341_v42  ;;  %v1313_v44 = vmul.f32 -1.442695, %v341_v42  ;;  %v114_v42 = vadd.f32 %v1608_v8, %v1658_v11 }
 0x751   :  { %1380 = vpow2.f32 %v1313_v44 }
 0x755   :  { %v1379_v43 = vpop.eup %1378 }
 0x756   :  { %364 = vrot.lane.b32.xlu0 %v1379_v43, %s1484_s12 }
 0x757   :  { %v1381_v45 = vpop.eup %1380 }
 0x758   :  { %v345_v46 = vadd.f32 1.0, %v1381_v45 }
 0x75a   :  { %1382 = vrcp.f32 %v345_v46  ;;  %v357_v52 = vand.u32 2147483648, %v345_v46  ;;  %vm351_vm15 = vweird.f32 %v345_v46  ;;  %v355_v53 = vand.u32 2147483647, %v345_v46 }
 0x75c   :  { %v358_v55 = vor.u32 1.1754944e-38, %v357_v52  ;;  %vm356_vm1 = vcmp.eq.f32.partialorder %v355_v53, 8.507059e+37 }
 0x760   :  { %v1383_v47 = vpop.eup %1382 }
 0x761   :  { %v347_v48 = vmul.f32 %v1383_v47, %v345_v46  ;;  %vm352_vm14 = vweird.f32 %v1383_v47 }
 0x762   :  { %vm353_vm0 = vmor %vm351_vm15, %vm352_vm14 }
 0x763   :  { %v348_v49 = vsub.f32 1.0, %v347_v48 }
 0x765   :  { %v349_v50 = vmul.f32 %v1383_v47, %v348_v49 }
 0x767   :  { %v350_v51 = vadd.f32 %v1383_v47, %v349_v50 }
 0x769   :  { %v354_v54 = vsel %vm353_vm0, %v1383_v47, %v350_v51 }
 0x76a   :  { %v359_v57 = vsel %vm356_vm1, %v358_v55, %v354_v54 }
 0x76b   :  { %v362_v59 = vmul.f32 %v359_v57, %v307_v35  ;;  %v652_v35 = vld [vmem:[%s1890_s4] sm:$0xff] }
 0x76c   :  { %703 = vmatpush.msrb.mxu3 %v652_v35 }
 0x7c8   :  { %v365_v56 = vpop.permute.xlu0 %364 }
 0x7c9   :  { %v367_v58 = vmul.f32 %v365_v56, %v359_v57 }
 0x7cb   :  { %369 = vrot.lane.b32.xlu1 %v367_v58, %s1484_s12 }
 0x83d   :  { %v370_v60 = vpop.permute.xlu1 %369 }
 0x83e   :  { %v372_v61 = vadd.f32 %v370_v60, %v362_v59 }
 0x840   :  { %1384 = vtanh.f32 %v372_v61 }
 0x846   :  { %v1385_v62 = vpop.eup %1384 }
 0x847   :  { %375 = vrot.lane.b32.xlu2 %v1385_v62, %s1484_s12 }
 0x8a1   :  { %v376_v63 = vpop.permute.xlu2 %375 }
 0x8a2   :  { %v378_v0 = vmul.f32 %v376_v63, %v359_v57 }
 0x8a4   :  { %380 = vrot.lane.b32.xlu0 %v378_v0, %s1485_s13 }
 0x916   :  { %v381_v1 = vpop.permute.xlu0 %380 }
 0x917   :  { %383 = vst.msk [vmem:[#allocation2 + $0x18] sm:$0xff] %vm122_vm5, %v381_v1  ;;  %1314 = vmatmul.msk.f32.vlgmr.msrb.gmra.mxu2 %vm122_vm5, %v381_v1 }
 0x91e   :  { %v647_v40 = vld [vmem:[#allocation2 + $0x18] sm:$0xff] }
 0x99a   :  { %v403_v3 = vpop.f32.mrf.mxu2 }
 0x99b   :  { %v406_v4 = vadd.f32 %v403_v3, %v111_v2  ;;  %v1715_v2 = vld [vmem:[%s1892_s5 + $0x18] sm:$0xff]  ;;  %v1720_v3 = vld [vmem:[%s1892_s5 + $0x10] sm:$0xff] }
 0x99c   :  { %741 = vmatpush.msrb.mxu1 %v1715_v2  ;;  %804 = vmatpush.msrb.mxu2 %v1715_v2 }
 0x99d   :  { %1386 = vtanh.f32 %v406_v4  ;;  %v1315_v6 = vmul.f32 -1.442695, %v406_v4  ;;  %v1727_v4 = vld [vmem:[%s1892_s5 + $0x8] sm:$0xff] }
 0x99e   :  { %742 = vmatpush.msrb.mxu1 %v1720_v3  ;;  %805 = vmatpush.msrb.mxu2 %v1720_v3 }
 0x99f   :  { %1388 = vpow2.f32 %v1315_v6 }
 0x9a0   :  { %743 = vmatpush.msrb.mxu1 %v1727_v4  ;;  %806 = vmatpush.msrb.mxu2 %v1727_v4 }
 0x9a3   :  { %v1387_v5 = vpop.eup %1386 }
 0x9a4   :  { %429 = vrot.lane.b32.xlu1 %v1387_v5, %s1484_s12  ;;  %v1734_v5 = vld [vmem:[%s1892_s5] sm:$0xff] }
 0x9a5   :  { %v1389_v9 = vpop.eup %1388  ;;  %744 = vmatpush.msrb.mxu1 %v1734_v5  ;;  %807 = vmatpush.msrb.mxu2 %v1734_v5 }
 0x9a6   :  { %v410_v14 = vadd.f32 1.0, %v1389_v9 }
 0x9a8   :  { %1390 = vrcp.f32 %v410_v14  ;;  %v422_v20 = vand.u32 2147483648, %v410_v14  ;;  %vm416_vm3 = vweird.f32 %v410_v14  ;;  %v420_v10 = vand.u32 2147483647, %v410_v14 }
 0x9aa   :  { %v423_v22 = vor.u32 1.1754944e-38, %v422_v20  ;;  %vm421_vm6 = vcmp.eq.f32.partialorder %v420_v10, 8.507059e+37 }
 0x9ae   :  { %v1391_v15 = vpop.eup %1390 }
 0x9af   :  { %v412_v16 = vmul.f32 %v1391_v15, %v410_v14  ;;  %vm417_vm2 = vweird.f32 %v1391_v15  ;;  %v117_v14 = vadd.f32 %v1608_v8, %v1660_v12 }
 0x9b0   :  { %vm418_vm4 = vmor %vm416_vm3, %vm417_vm2 }
 0x9b1   :  { %v413_v17 = vsub.f32 1.0, %v412_v16 }
 0x9b3   :  { %v414_v18 = vmul.f32 %v1391_v15, %v413_v17  ;;  %v1757_v17 = vld [vmem:[%s1891_s6] ss:$0 sm:$0xff] }
 0x9b5   :  { %v415_v19 = vadd.f32 %v1391_v15, %v414_v18 }
 0x9b7   :  { %v419_v21 = vsel %vm418_vm4, %v1391_v15, %v415_v19 }
 0x9b8   :  { %v424_v24 = vsel %vm421_vm6, %v423_v22, %v419_v21 }
 0x9b9   :  { %v427_v26 = vmul.f32 %v424_v24, %v372_v61 }
 0xa16   :  { %v430_v23 = vpop.permute.xlu1 %429 }
 0xa17   :  { %v432_v25 = vmul.f32 %v430_v23, %v424_v24 }
 0xa19   :  { %434 = vrot.lane.b32.xlu2 %v432_v25, %s1484_s12 }
 0xa73   :  { %v435_v27 = vpop.permute.xlu2 %434 }
 0xa74   :  { %v437_v28 = vadd.f32 %v435_v27, %v427_v26 }
 0xa76   :  { %1392 = vtanh.f32 %v437_v28 }
 0xa7c   :  { %v1393_v29 = vpop.eup %1392 }
 0xa7d   :  { %440 = vrot.lane.b32.xlu0 %v1393_v29, %s1484_s12 }
 0xaef   :  { %v441_v30 = vpop.permute.xlu0 %440 }
 0xaf0   :  { %v443_v31 = vmul.f32 %v441_v30, %v424_v24 }
 0xaf2   :  { %445 = vrot.lane.b32.xlu1 %v443_v31, %s1485_s13 }
 0xb64   :  { %v446_v36 = vpop.permute.xlu1 %445 }
 0xb65   :  { %448 = vst.msk [vmem:[#allocation2 + $0x20] sm:$0xff] %vm122_vm5, %v446_v36  ;;  %1316 = vmatmul.msk.f32.vlgmr.msra.gmra.mxu3 %vm122_vm5, %v446_v36 }
 0xb6c   :  { %v648_v41 = vld [vmem:[#allocation2 + $0x20] sm:$0xff] }
 0xb6d   :  { %1322 = vmatmul.msk.f32.vlgmr.msrb.gmra.mxu3 %vm122_vm5, %v644_v37 }
 0xb75   :  { %1323 = vmatmul.msk.f32.gmra.mxu3 %vm122_vm5, %v645_v38 }
 0xb7d   :  { %1324 = vmatmul.msk.f32.gmra.mxu3 %vm122_vm5, %v646_v39 }
 0xb85   :  { %1325 = vmatmul.msk.f32.gmra.mxu3 %vm122_vm5, %v647_v40 }
 0xb8d   :  { %1326 = vmatmul.msk.f32.gmra.mxu3 %vm122_vm5, %v648_v41 }
 0xbe8   :  { %v468_v43 = vpop.f32.mrf.mxu3 }
 0xbe9   :  { %v471_v44 = vadd.f32 %v468_v43, %v114_v42 }
 0xbeb   :  { %1394 = vtanh.f32 %v471_v44  ;;  %v1317_v46 = vmul.f32 -1.442695, %v471_v44 }
 0xbed   :  { %1396 = vpow2.f32 %v1317_v46 }
 0xbf1   :  { %v1395_v45 = vpop.eup %1394 }
 0xbf2   :  { %494 = vrot.lane.b32.xlu2 %v1395_v45, %s1484_s12 }
 0xbf3   :  { %v1397_v47 = vpop.eup %1396 }
 0xbf4   :  { %v475_v48 = vadd.f32 1.0, %v1397_v47 }
 0xbf6   :  { %1398 = vrcp.f32 %v475_v48  ;;  %v487_v54 = vand.u32 2147483648, %v475_v48  ;;  %vm481_vm8 = vweird.f32 %v475_v48  ;;  %v485_v11 = vand.u32 2147483647, %v475_v48 }
 0xbf8   :  { %v488_v56 = vor.u32 1.1754944e-38, %v487_v54  ;;  %vm486_vm10 = vcmp.eq.f32.partialorder %v485_v11, 8.507059e+37 }
 0xbfc   :  { %v1399_v49 = vpop.eup %1398 }
 0xbfd   :  { %v477_v50 = vmul.f32 %v1399_v49, %v475_v48  ;;  %vm482_vm7 = vweird.f32 %v1399_v49 }
 0xbfe   :  { %vm483_vm9 = vmor %vm481_vm8, %vm482_vm7 }
 0xbff   :  { %v478_v51 = vsub.f32 1.0, %v477_v50 }
 0xc01   :  { %v479_v52 = vmul.f32 %v1399_v49, %v478_v51 }
 0xc03   :  { %v480_v53 = vadd.f32 %v1399_v49, %v479_v52 }
 0xc05   :  { %v484_v55 = vsel %vm483_vm9, %v1399_v49, %v480_v53 }
 0xc06   :  { %v489_v58 = vsel %vm486_vm10, %v488_v56, %v484_v55 }
 0xc07   :  { %v492_v60 = vmul.f32 %v489_v58, %v437_v28 }
 0xc4c   :  { %v495_v57 = vpop.permute.xlu2 %494 }
 0xc4d   :  { %v497_v59 = vmul.f32 %v495_v57, %v489_v58 }
 0xc4f   :  { %499 = vrot.lane.b32.xlu0 %v497_v59, %s1484_s12 }
 0xcc1   :  { %v500_v61 = vpop.permute.xlu0 %499 }
 0xcc2   :  { %v1707_v62 = vadd.f32 %v500_v61, %v492_v60 }
 0xcc4   :  { %1400 = vtanh.f32 %v1707_v62 }
 0xcca   :  { %v1401_v63 = vpop.eup %1400 }
 0xccb   :  { %505 = vrot.lane.b32.xlu1 %v1401_v63, %s1484_s12 }
 0xd3d   :  { %v506_v0 = vpop.permute.xlu1 %505 }
 0xd3e   :  { %v508_v1 = vmul.f32 %v506_v0, %v489_v58 }
 0xd40   :  { %510 = vrot.lane.b32.xlu2 %v508_v1, %s1485_s13 }
 0xd9a   :  { %v511_v6 = vpop.permute.xlu2 %510 }
 0xd9b   :  { %513 = vst.msk [vmem:[#allocation2 + $0x28] sm:$0xff] %vm122_vm5, %v511_v6  ;;  %1318 = vmatmul.msk.f32.vlgmr.msra.gmra.mxu1 %vm122_vm5, %v511_v6 }
 0xd9c   :  { %867 = vmatpush.msra.mxu1 %v1715_v2 }
 0xd9e   :  { %868 = vmatpush.msra.mxu1 %v1720_v3 }
 0xda0   :  { %869 = vmatpush.msra.mxu1 %v1727_v4 }
 0xda2   :  { %v649_v9 = vld [vmem:[#allocation2 + $0x28] sm:$0xff]  ;;  %870 = vmatpush.msra.mxu1 %v1734_v5 }
 0xda3   :  { %1327 = vmatmul.msk.f32.gmra.mxu3 %vm122_vm5, %v649_v9  ;;  %745 = vmatmul.f32.vlgmr.msrb.gmra.mxu1 %v1483_v7  ;;  %v705_v7 = vpop.f32.mrf.mxu3 }
 0xda4   :  { %993 = vmatpush.msrb.mxu1 %v1715_v2  ;;  %v706_v18 = vadd.f32 %v1757_v17, %v705_v7 }
 0xda6   :  { %994 = vmatpush.msrb.mxu1 %v1720_v3 }
 0xda8   :  { %995 = vmatpush.msrb.mxu1 %v1727_v4 }
 0xdaa   :  { %996 = vmatpush.msrb.mxu1 %v1734_v5 }
 0xdab   :  { %v708_v1 = vpop.f32.mrf.mxu3 }
 0xdac   :  { %v709_v6 = vadd.f32 %v1757_v17, %v708_v1 }
 0xe18   :  { %v533_v15 = vpop.f32.mrf.mxu1 }
 0xe19   :  { %v536_v16 = vadd.f32 %v533_v15, %v117_v14 }
 0xe1b   :  { %1402 = vtanh.f32 %v536_v16  ;;  %v1319_v8 = vmul.f32 -1.442695, %v536_v16 }
 0xe20   :  { %v746_v19 = vpop.f32.mrf.mxu1 }
 0xe21   :  { %v1403_v20 = vpop.eup %1402  ;;  %v749_v10 = vadd.f32 %v746_v19, %v706_v18 }
 0xe22   :  { %559 = vrot.lane.b32.xlu0 %v1403_v20, %s1484_s12 }
 0xe23   :  { %1404 = vtanh.f32 %v749_v10  ;;  %v1330_v12 = vmul.f32 -1.442695, %v749_v10 }
 0xe24   :  { %1406 = vpow2.f32 %v1319_v8 }
 0xe25   :  { %1408 = vpow2.f32 %v1330_v12 }
 0xe29   :  { %v1405_v21 = vpop.eup %1404 }
 0xe2a   :  { %772 = vrot.lane.b32.xlu1 %v1405_v21, %s1484_s12  ;;  %v1407_v22 = vpop.eup %1406 }
 0xe2b   :  { %v540_v23 = vadd.f32 1.0, %v1407_v22  ;;  %v1409_v24 = vpop.eup %1408 }
 0xe2c   :  { %v753_v25 = vadd.f32 1.0, %v1409_v24 }
 0xe2d   :  { %1410 = vrcp.f32 %v540_v23  ;;  %v552_v34 = vand.u32 2147483648, %v540_v23  ;;  %vm546_vm12 = vweird.f32 %v540_v23  ;;  %v550_v35 = vand.u32 2147483647, %v540_v23 }
 0xe2e   :  { %1412 = vrcp.f32 %v753_v25  ;;  %v765_v43 = vand.u32 2147483648, %v753_v25  ;;  %vm759_vm0 = vweird.f32 %v753_v25  ;;  %v763_v44 = vand.u32 2147483647, %v753_v25 }
 0xe2f   :  { %v553_v38 = vor.u32 1.1754944e-38, %v552_v34  ;;  %vm551_vm14 = vcmp.eq.f32.partialorder %v550_v35, 8.507059e+37  ;;  %v711_v35 = vpop.f32.mrf.mxu3 }
 0xe30   :  { %v766_v46 = vor.u32 1.1754944e-38, %v765_v43  ;;  %vm764_vm2 = vcmp.eq.f32.partialorder %v763_v44, 8.507059e+37 }
 0xe33   :  { %v1411_v26 = vpop.eup %1410 }
 0xe34   :  { %v542_v27 = vmul.f32 %v1411_v26, %v540_v23  ;;  %v1413_v29 = vpop.eup %1412  ;;  %vm547_vm11 = vweird.f32 %v1411_v26 }
 0xe35   :  { %v755_v31 = vmul.f32 %v1413_v29, %v753_v25  ;;  %vm548_vm13 = vmor %vm546_vm12, %vm547_vm11  ;;  %vm760_vm15 = vweird.f32 %v1413_v29 }
 0xe36   :  { %v543_v28 = vsub.f32 1.0, %v542_v27  ;;  %vm761_vm1 = vmor %vm759_vm0, %vm760_vm15 }
 0xe37   :  { %v756_v33 = vsub.f32 1.0, %v755_v31 }
 0xe38   :  { %v544_v30 = vmul.f32 %v1411_v26, %v543_v28 }
 0xe39   :  { %v757_v37 = vmul.f32 %v1413_v29, %v756_v33 }
 0xe3a   :  { %v545_v32 = vadd.f32 %v1411_v26, %v544_v30 }
 0xe3b   :  { %v758_v42 = vadd.f32 %v1413_v29, %v757_v37 }
 0xe3c   :  { %v549_v36 = vsel %vm548_vm13, %v1411_v26, %v545_v32 }
 0xe3d   :  { %v554_v40 = vsel %vm551_vm14, %v553_v38, %v549_v36  ;;  %v762_v45 = vsel %vm761_vm1, %v1413_v29, %v758_v42  ;;  %v712_v36 = vadd.f32 %v1757_v17, %v711_v35 }
 0xe3e   :  { %v767_v48 = vsel %vm764_vm2, %v766_v46, %v762_v45  ;;  %v557_v50 = vmul.f32 %v554_v40, %v1707_v62 }
 0xe3f   :  { %v770_v54 = vmul.f32 0.0, %v767_v48 }
 0xe94   :  { %v560_v39 = vpop.permute.xlu0 %559 }
 0xe95   :  { %v562_v41 = vmul.f32 %v560_v39, %v554_v40 }
 0xe97   :  { %564 = vrot.lane.b32.xlu2 %v562_v41, %s1484_s12 }
 0xe9c   :  { %v773_v47 = vpop.permute.xlu1 %772 }
 0xe9d   :  { %v775_v49 = vmul.f32 %v773_v47, %v767_v48 }
 0xe9f   :  { %777 = vrot.lane.b32.xlu0 %v775_v49, %s1484_s12 }
 0xef1   :  { %v565_v51 = vpop.permute.xlu2 %564 }
 0xef2   :  { %v1765_v52 = vadd.f32 %v565_v51, %v557_v50 }
 0xef4   :  { %1414 = vtanh.f32 %v1765_v52 }
 0xefa   :  { %v1415_v53 = vpop.eup %1414 }
 0xefb   :  { %570 = vrot.lane.b32.xlu1 %v1415_v53, %s1484_s12 }
 0xf11   :  { %v778_v11 = vpop.permute.xlu0 %777 }
 0xf12   :  { %v780_v55 = vadd.f32 %v778_v11, %v770_v54 }
 0xf14   :  { %1416 = vtanh.f32 %v780_v55 }
 0xf1a   :  { %v1417_v56 = vpop.eup %1416 }
 0xf1b   :  { %783 = vrot.lane.b32.xlu2 %v1417_v56, %s1484_s12 }
 0xf6d   :  { %v571_v57 = vpop.permute.xlu1 %570 }
 0xf6e   :  { %v573_v58 = vmul.f32 %v571_v57, %v554_v40 }
 0xf70   :  { %575 = vrot.lane.b32.xlu0 %v573_v58, %s1485_s13 }
 0xf75   :  { %v784_v59 = vpop.permute.xlu2 %783 }
 0xf76   :  { %v786_v60 = vmul.f32 %v784_v59, %v767_v48 }
 0xf78   :  { %788 = vrot.lane.b32.xlu1 %v786_v60, %s1485_s13 }
 0xfe2   :  { %v576_v61 = vpop.permute.xlu0 %575 }
 0xfe3   :  { %578 = vst.msk [vmem:[#allocation2 + $0x30] sm:$0xff] %vm122_vm5, %v576_v61  ;;  %1320 = vmatmul.msk.f32.vlgmr.msra.gmra.mxu2 %vm122_vm5, %v576_v61 }
 0xfe4   :  { %930 = vmatpush.msra.mxu2 %v1715_v2 }
 0xfe6   :  { %931 = vmatpush.msra.mxu2 %v1720_v3 }
 0xfe8   :  { %932 = vmatpush.msra.mxu2 %v1727_v4 }
 0xfea   :  { %v789_v62 = vpop.permute.xlu1 %788  ;;  %v650_v63 = vld [vmem:[#allocation2 + $0x30] sm:$0xff]  ;;  %933 = vmatpush.msra.mxu2 %v1734_v5 }
 0xfeb   :  { %1328 = vmatmul.msk.f32.gmra.mxu3 %vm122_vm5, %v650_v63  ;;  %1331 = vmatmul.msk.f32.vlgmr.msrb.gmra.mxu2 %vm122_vm5, %v789_v62  ;;  %v714_v62 = vpop.f32.mrf.mxu3 }
 0xfec   :  { %1056 = vmatpush.msrb.mxu2 %v1715_v2  ;;  %v715_v63 = vadd.f32 %v1757_v17, %v714_v62 }
 0xfee   :  { %1057 = vmatpush.msrb.mxu2 %v1720_v3 }
 0xff0   :  { %1058 = vmatpush.msrb.mxu2 %v1727_v4 }
 0xff2   :  { %1059 = vmatpush.msrb.mxu2 %v1734_v5 }
0x1066   :  { %v1784_v0 = vpop.f32.mrf.mxu2 }
0x106e   :  { %v809_v9 = vpop.f32.mrf.mxu2 }
0x106f   :  { %v812_v14 = vadd.f32 %v809_v9, %v709_v6 }
0x1071   :  { %1418 = vtanh.f32 %v812_v14  ;;  %v1332_v16 = vmul.f32 -1.442695, %v812_v14 }
0x1073   :  { %1420 = vpow2.f32 %v1332_v16 }
0x1077   :  { %v1419_v15 = vpop.eup %1418 }
0x1078   :  { %835 = vrot.lane.b32.xlu2 %v1419_v15, %s1484_s12 }
0x1079   :  { %v1421_v7 = vpop.eup %1420 }
0x107a   :  { %v816_v18 = vadd.f32 1.0, %v1421_v7 }
0x107c   :  { %1422 = vrcp.f32 %v816_v18  ;;  %v828_v12 = vand.u32 2147483648, %v816_v18  ;;  %vm822_vm4 = vweird.f32 %v816_v18  ;;  %v826_v22 = vand.u32 2147483647, %v816_v18 }
0x107e   :  { %v829_v24 = vor.u32 1.1754944e-38, %v828_v12  ;;  %vm827_vm7 = vcmp.eq.f32.partialorder %v826_v22, 8.507059e+37 }
0x1082   :  { %v1423_v19 = vpop.eup %1422 }
0x1083   :  { %v818_v20 = vmul.f32 %v1423_v19, %v816_v18  ;;  %vm823_vm3 = vweird.f32 %v1423_v19 }
0x1084   :  { %vm824_vm6 = vmor %vm822_vm4, %vm823_vm3 }
0x1085   :  { %v819_v10 = vsub.f32 1.0, %v818_v20 }
0x1087   :  { %v820_v21 = vmul.f32 %v1423_v19, %v819_v10 }
0x1089   :  { %v821_v8 = vadd.f32 %v1423_v19, %v820_v21 }
0x108b   :  { %v825_v23 = vsel %vm824_vm6, %v1423_v19, %v821_v8 }
0x108c   :  { %v830_v26 = vsel %vm827_vm7, %v829_v24, %v825_v23 }
0x108d   :  { %v833_v28 = vmul.f32 %v830_v26, %v780_v55 }
0x10d2   :  { %v836_v25 = vpop.permute.xlu2 %835 }
0x10d3   :  { %v838_v27 = vmul.f32 %v836_v25, %v830_v26 }
0x10d5   :  { %840 = vrot.lane.b32.xlu0 %v838_v27, %s1484_s12 }
0x1147   :  { %v841_v29 = vpop.permute.xlu0 %840 }
0x1148   :  { %v843_v30 = vadd.f32 %v841_v29, %v833_v28  ;;  %v717_v29 = vpop.f32.mrf.mxu3 }
0x114a   :  { %1424 = vtanh.f32 %v843_v30 }
0x1150   :  { %v1425_v31 = vpop.eup %1424 }
0x1151   :  { %846 = vrot.lane.b32.xlu1 %v1425_v31, %s1484_s12 }
0x11c3   :  { %v847_v32 = vpop.permute.xlu1 %846 }
0x11c4   :  { %v849_v33 = vmul.f32 %v847_v32, %v830_v26 }
0x11c6   :  { %851 = vrot.lane.b32.xlu2 %v849_v33, %s1485_s13 }
0x1220   :  { %v852_v34 = vpop.permute.xlu2 %851 }
0x1221   :  { %1333 = vmatmul.msk.f32.vlgmr.msra.gmra.mxu1 %vm122_vm5, %v852_v34 }
0x1222   :  { %1119 = vmatpush.msra.mxu1 %v1715_v2 }
0x1224   :  { %1120 = vmatpush.msra.mxu1 %v1720_v3 }
0x1226   :  { %1121 = vmatpush.msra.mxu1 %v1727_v4 }
0x1228   :  { %1122 = vmatpush.msra.mxu1 %v1734_v5 }
0x129e   :  { %v872_v37 = vpop.f32.mrf.mxu1 }
0x129f   :  { %v875_v38 = vadd.f32 %v872_v37, %v712_v36 }
0x12a1   :  { %1426 = vtanh.f32 %v875_v38  ;;  %v1334_v40 = vmul.f32 -1.442695, %v875_v38 }
0x12a3   :  { %1428 = vpow2.f32 %v1334_v40 }
0x12a7   :  { %v1427_v39 = vpop.eup %1426 }
0x12a8   :  { %898 = vrot.lane.b32.xlu0 %v1427_v39, %s1484_s12 }
0x12a9   :  { %v1429_v41 = vpop.eup %1428 }
0x12aa   :  { %v879_v42 = vadd.f32 1.0, %v1429_v41 }
0x12ac   :  { %1430 = vrcp.f32 %v879_v42  ;;  %v891_v48 = vand.u32 2147483648, %v879_v42  ;;  %vm885_vm9 = vweird.f32 %v879_v42  ;;  %v889_v49 = vand.u32 2147483647, %v879_v42 }
0x12ae   :  { %v892_v51 = vor.u32 1.1754944e-38, %v891_v48  ;;  %vm890_vm11 = vcmp.eq.f32.partialorder %v889_v49, 8.507059e+37 }
0x12b2   :  { %v1431_v43 = vpop.eup %1430 }
0x12b3   :  { %v881_v44 = vmul.f32 %v1431_v43, %v879_v42  ;;  %vm886_vm8 = vweird.f32 %v1431_v43 }
0x12b4   :  { %vm887_vm10 = vmor %vm885_vm9, %vm886_vm8 }
0x12b5   :  { %v882_v45 = vsub.f32 1.0, %v881_v44 }
0x12b7   :  { %v883_v46 = vmul.f32 %v1431_v43, %v882_v45 }
0x12b9   :  { %v884_v47 = vadd.f32 %v1431_v43, %v883_v46 }
0x12bb   :  { %v888_v50 = vsel %vm887_vm10, %v1431_v43, %v884_v47 }
0x12bc   :  { %v893_v54 = vsel %vm890_vm11, %v892_v51, %v888_v50 }
0x12bd   :  { %v896_v55 = vmul.f32 %v893_v54, %v843_v30  ;;  %v718_v30 = vadd.f32 %v1757_v17, %v717_v29 }
0x131a   :  { %v899_v53 = vpop.permute.xlu0 %898 }
0x131b   :  { %v901_v11 = vmul.f32 %v899_v53, %v893_v54 }
0x131d   :  { %903 = vrot.lane.b32.xlu1 %v901_v11, %s1484_s12 }
0x138f   :  { %v904_v56 = vpop.permute.xlu1 %903 }
0x1390   :  { %v906_v57 = vadd.f32 %v904_v56, %v896_v55  ;;  %v720_v56 = vpop.f32.mrf.mxu3 }
0x1392   :  { %1432 = vtanh.f32 %v906_v57 }
0x1398   :  { %v1433_v58 = vpop.eup %1432 }
0x1399   :  { %909 = vrot.lane.b32.xlu2 %v1433_v58, %s1484_s12 }
0x13f3   :  { %v910_v59 = vpop.permute.xlu2 %909 }
0x13f4   :  { %v912_v60 = vmul.f32 %v910_v59, %v893_v54 }
0x13f6   :  { %914 = vrot.lane.b32.xlu0 %v912_v60, %s1485_s13 }
0x1468   :  { %v915_v61 = vpop.permute.xlu0 %914 }
0x1469   :  { %1335 = vmatmul.msk.f32.vlgmr.msra.gmra.mxu2 %vm122_vm5, %v915_v61 }
0x146a   :  { %1182 = vmatpush.msra.mxu2 %v1715_v2 }
0x146c   :  { %1183 = vmatpush.msra.mxu2 %v1720_v3 }
0x146e   :  { %1184 = vmatpush.msra.mxu2 %v1727_v4 }
0x1470   :  { %1185 = vmatpush.msra.mxu2 %v1734_v5 }
0x14ec   :  { %v935_v1 = vpop.f32.mrf.mxu2 }
0x14ed   :  { %v938_v6 = vadd.f32 %v935_v1, %v715_v63 }
0x14ef   :  { %1434 = vtanh.f32 %v938_v6  ;;  %v1336_v14 = vmul.f32 -1.442695, %v938_v6 }
0x14f1   :  { %1436 = vpow2.f32 %v1336_v14 }
0x14f5   :  { %v1435_v9 = vpop.eup %1434 }
0x14f6   :  { %961 = vrot.lane.b32.xlu1 %v1435_v9, %s1484_s12 }
0x14f7   :  { %v1437_v15 = vpop.eup %1436 }
0x14f8   :  { %v942_v16 = vadd.f32 1.0, %v1437_v15 }
0x14fa   :  { %1438 = vrcp.f32 %v942_v16  ;;  %v954_v5 = vand.u32 2147483648, %v942_v16  ;;  %vm948_vm13 = vweird.f32 %v942_v16  ;;  %v952_v19 = vand.u32 2147483647, %v942_v16 }
0x14fc   :  { %v955_v10 = vor.u32 1.1754944e-38, %v954_v5  ;;  %vm953_vm15 = vcmp.eq.f32.partialorder %v952_v19, 8.507059e+37 }
0x1500   :  { %v1439_v2 = vpop.eup %1438 }
0x1501   :  { %v944_v3 = vmul.f32 %v1439_v2, %v942_v16  ;;  %vm949_vm12 = vweird.f32 %v1439_v2 }
0x1502   :  { %vm950_vm14 = vmor %vm948_vm13, %vm949_vm12 }
0x1503   :  { %v945_v7 = vsub.f32 1.0, %v944_v3 }
0x1505   :  { %v946_v4 = vmul.f32 %v1439_v2, %v945_v7  ;;  %v1482_v7 = vld [vmem:[%s1889_s3] ss:$0 sm:$0xff] }
0x1507   :  { %v947_v18 = vadd.f32 %v1439_v2, %v946_v4  ;;  %v120_v4 = vadd.f32 %v1482_v7, %v1662_v13 }
0x1509   :  { %v951_v20 = vsel %vm950_vm14, %v1439_v2, %v947_v18  ;;  %v601_v5 = vadd.f32 %v1784_v0, %v120_v4 }
0x150a   :  { %v956_v8 = vsel %vm953_vm15, %v955_v10, %v951_v20 }
0x150b   :  { %v959_v22 = vmul.f32 %v956_v8, %v906_v57  ;;  %v721_v57 = vadd.f32 %v1757_v17, %v720_v56 }
0x1568   :  { %v962_v21 = vpop.permute.xlu1 %961 }
0x1569   :  { %v964_v12 = vmul.f32 %v962_v21, %v956_v8 }
0x156b   :  { %966 = vrot.lane.b32.xlu2 %v964_v12, %s1484_s12 }
0x15c5   :  { %v967_v23 = vpop.permute.xlu2 %966 }
0x15c6   :  { %v969_v24 = vadd.f32 %v967_v23, %v959_v22  ;;  %v1321_v23 = vmul.f32 -1.442695, %v601_v5 }
0x15c8   :  { %1440 = vtanh.f32 %v969_v24 }
0x15ce   :  { %v1441_v25 = vpop.eup %1440 }
0x15cf   :  { %972 = vrot.lane.b32.xlu0 %v1441_v25, %s1484_s12 }
0x1641   :  { %v973_v26 = vpop.permute.xlu0 %972 }
0x1642   :  { %v975_v27 = vmul.f32 %v973_v26, %v956_v8 }
0x1644   :  { %977 = vrot.lane.b32.xlu1 %v975_v27, %s1485_s13 }
0x16b6   :  { %v978_v28 = vpop.permute.xlu1 %977 }
0x16b7   :  { %1337 = vmatmul.msk.f32.vlgmr.msrb.gmra.mxu1 %vm122_vm5, %v978_v28 }
0x1734   :  { %v998_v31 = vpop.f32.mrf.mxu1 }
0x1735   :  { %v1001_v32 = vadd.f32 %v998_v31, %v718_v30 }
0x1737   :  { %1442 = vtanh.f32 %v1001_v32  ;;  %v1338_v34 = vmul.f32 -1.442695, %v1001_v32 }
0x1739   :  { %1444 = vpow2.f32 %v1338_v34 }
0x173d   :  { %v1443_v33 = vpop.eup %1442 }
0x173e   :  { %1024 = vrot.lane.b32.xlu2 %v1443_v33, %s1484_s12 }
0x173f   :  { %v1445_v35 = vpop.eup %1444 }
0x1740   :  { %v1005_v36 = vadd.f32 1.0, %v1445_v35 }
0x1742   :  { %1446 = vrcp.f32 %v1005_v36  ;;  %v1017_v42 = vand.u32 2147483648, %v1005_v36  ;;  %vm1011_vm1 = vweird.f32 %v1005_v36  ;;  %v1015_v43 = vand.u32 2147483647, %v1005_v36 }
0x1744   :  { %v1018_v45 = vor.u32 1.1754944e-38, %v1017_v42  ;;  %vm1016_vm3 = vcmp.eq.f32.partialorder %v1015_v43, 8.507059e+37 }
0x1748   :  { %v1447_v37 = vpop.eup %1446 }
0x1749   :  { %v1007_v38 = vmul.f32 %v1447_v37, %v1005_v36  ;;  %vm1012_vm0 = vweird.f32 %v1447_v37 }
0x174a   :  { %vm1013_vm2 = vmor %vm1011_vm1, %vm1012_vm0 }
0x174b   :  { %v1008_v39 = vsub.f32 1.0, %v1007_v38 }
0x174d   :  { %v1009_v40 = vmul.f32 %v1447_v37, %v1008_v39 }
0x174f   :  { %v1010_v41 = vadd.f32 %v1447_v37, %v1009_v40  ;;  %v723_v40 = vpop.f32.mrf.mxu3 }
0x1751   :  { %v1014_v44 = vsel %vm1013_vm2, %v1447_v37, %v1010_v41  ;;  %v724_v41 = vadd.f32 %v1757_v17, %v723_v40 }
0x1752   :  { %v1019_v47 = vsel %vm1016_vm3, %v1018_v45, %v1014_v44 }
0x1753   :  { %v1022_v49 = vmul.f32 %v1019_v47, %v969_v24 }
0x1798   :  { %v1025_v46 = vpop.permute.xlu2 %1024 }
0x1799   :  { %v1027_v48 = vmul.f32 %v1025_v46, %v1019_v47 }
0x179b   :  { %1029 = vrot.lane.b32.xlu0 %v1027_v48, %s1484_s12 }
0x180d   :  { %v1030_v50 = vpop.permute.xlu0 %1029 }
0x180e   :  { %v1032_v51 = vadd.f32 %v1030_v50, %v1022_v49 }
0x1810   :  { %1448 = vtanh.f32 %v1032_v51 }
0x1816   :  { %v1449_v53 = vpop.eup %1448 }
0x1817   :  { %1035 = vrot.lane.b32.xlu1 %v1449_v53, %s1484_s12 }
0x1889   :  { %v1036_v54 = vpop.permute.xlu1 %1035 }
0x188a   :  { %v1038_v11 = vmul.f32 %v1036_v54, %v1019_v47 }
0x188c   :  { %1040 = vrot.lane.b32.xlu2 %v1038_v11, %s1485_s13 }
0x18e6   :  { %v1041_v55 = vpop.permute.xlu2 %1040 }
0x18e7   :  { %1339 = vmatmul.msk.f32.vlgmr.msrb.gmra.mxu2 %vm122_vm5, %v1041_v55 }
0x196a   :  { %v1061_v58 = vpop.f32.mrf.mxu2 }
0x196b   :  { %v1064_v59 = vadd.f32 %v1061_v58, %v721_v57 }
0x196d   :  { %1450 = vtanh.f32 %v1064_v59  ;;  %v1340_v61 = vmul.f32 -1.442695, %v1064_v59 }
0x196f   :  { %1452 = vpow2.f32 %v1340_v61 }
0x1973   :  { %v1451_v60 = vpop.eup %1450 }
0x1974   :  { %1087 = vrot.lane.b32.xlu0 %v1451_v60, %s1484_s12 }
0x1975   :  { %v1453_v62 = vpop.eup %1452 }
0x1976   :  { %v1068_v63 = vadd.f32 1.0, %v1453_v62 }
0x1978   :  { %1454 = vrcp.f32 %v1068_v63  ;;  %v1080_v16 = vand.u32 2147483648, %v1068_v63  ;;  %vm1074_vm6 = vweird.f32 %v1068_v63  ;;  %v1078_v2 = vand.u32 2147483647, %v1068_v63 }
0x1979   :  { %1456 = vtanh.f32 %v601_v5 }
0x197a   :  { %v1081_v18 = vor.u32 1.1754944e-38, %v1080_v16  ;;  %vm1079_vm8 = vcmp.eq.f32.partialorder %v1078_v2, 8.507059e+37 }
0x197e   :  { %v1455_v1 = vpop.eup %1454 }
0x197f   :  { %v1070_v6 = vmul.f32 %v1455_v1, %v1068_v63  ;;  %vm1075_vm4 = vweird.f32 %v1455_v1  ;;  %v1457_v21 = vpop.eup %1456 }
0x1980   :  { %vm1076_vm7 = vmor %vm1074_vm6, %vm1075_vm4  ;;  %vm1293_vm6 = vcmask 31744  }
0x1981   :  { %v1071_v9 = vsub.f32 1.0, %v1070_v6 }
0x1983   :  { %v1072_v14 = vmul.f32 %v1455_v1, %v1071_v9 }
0x1985   :  { %v1073_v15 = vadd.f32 %v1455_v1, %v1072_v14 }
0x1987   :  { %v1077_v3 = vsel %vm1076_vm7, %v1455_v1, %v1073_v15 }
0x1988   :  { %v1082_v20 = vsel %vm1079_vm8, %v1081_v18, %v1077_v3 }
0x1989   :  { %v1085_v8 = vmul.f32 %v1082_v20, %v1032_v51 }
0x19e6   :  { %v1088_v19 = vpop.permute.xlu0 %1087 }
0x19e7   :  { %v1090_v10 = vmul.f32 %v1088_v19, %v1082_v20 }
0x19e9   :  { %1092 = vrot.lane.b32.xlu1 %v1090_v10, %s1484_s12 }
0x19f1   :  { %624 = vrot.lane.b32.xlu1 %v1457_v21, %s1484_s12 }
0x1a5b   :  { %v1093_v12 = vpop.permute.xlu1 %1092 }
0x1a5c   :  { %v1827_v22 = vadd.f32 %v1093_v12, %v1085_v8 }
0x1a5e   :  { %1458 = vtanh.f32 %v1827_v22 }
0x1a5f   :  { %1460 = vpow2.f32 %v1321_v23 }
0x1a63   :  { %v625_v36 = vpop.permute.xlu1 %624 }
0x1a64   :  { %v1459_v13 = vpop.eup %1458 }
0x1a65   :  { %1098 = vrot.lane.b32.xlu2 %v1459_v13, %s1484_s12  ;;  %v1461_v0 = vpop.eup %1460 }
0x1a66   :  { %v605_v24 = vadd.f32 1.0, %v1461_v0 }
0x1a68   :  { %1462 = vrcp.f32 %v605_v24  ;;  %v617_v32 = vand.u32 2147483648, %v605_v24  ;;  %vm611_vm10 = vweird.f32 %v605_v24  ;;  %v615_v33 = vand.u32 2147483647, %v605_v24 }
0x1a6a   :  { %v618_v35 = vor.u32 1.1754944e-38, %v617_v32  ;;  %vm616_vm12 = vcmp.eq.f32.partialorder %v615_v33, 8.507059e+37 }
0x1a6e   :  { %v1463_v25 = vpop.eup %1462 }
0x1a6f   :  { %v607_v26 = vmul.f32 %v1463_v25, %v605_v24  ;;  %vm612_vm9 = vweird.f32 %v1463_v25 }
0x1a70   :  { %vm613_vm11 = vmor %vm611_vm10, %vm612_vm9 }
0x1a71   :  { %v608_v27 = vsub.f32 1.0, %v607_v26 }
0x1a73   :  { %v609_v28 = vmul.f32 %v1463_v25, %v608_v27 }
0x1a75   :  { %v610_v30 = vadd.f32 %v1463_v25, %v609_v28 }
0x1a77   :  { %v614_v34 = vsel %vm613_vm11, %v1463_v25, %v610_v30 }
0x1a78   :  { %v619_v37 = vsel %vm616_vm12, %v618_v35, %v614_v34  ;;  %v1231_v35 = vld [vmem:[%s1893_s7 + $0x18] sm:$0xff] }
0x1a79   :  { %v627_v38 = vmul.f32 %v625_v36, %v619_v37  ;;  %v622_v45 = vmul.f32 %v619_v37, %v1765_v52  ;;  %v1230_v36 = vld [vmem:[%s1893_s7 + $0x10] sm:$0xff]  ;;  %1253 = vmatpush.msrb.mxu1 %v1231_v35 }
0x1a7b   :  { %1254 = vmatpush.msrb.mxu1 %v1230_v36 }
0x1abf   :  { %v1099_v29 = vpop.permute.xlu2 %1098 }
0x1ac0   :  { %v1101_v31 = vmul.f32 %v1099_v29, %v1082_v20 }
0x1ac2   :  { %1103 = vrot.lane.b32.xlu0 %v1101_v31, %s1485_s13 }
0x1aca   :  { %629 = vrot.lane.b32.xlu0 %v627_v38, %s1484_s12  ;;  %v1228_v38 = vld [vmem:[%s1893_s7] sm:$0xff] }
0x1b34   :  { %v1104_v39 = vpop.permute.xlu0 %1103 }
0x1b35   :  { %1341 = vmatmul.msk.f32.vlgmr.msra.gmra.mxu1 %vm122_vm5, %v1104_v39 }
0x1b3c   :  { %v630_v44 = vpop.permute.xlu0 %629 }
0x1b3d   :  { %v632_v46 = vadd.f32 %v630_v44, %v622_v45  ;;  %v1263_v44 = vld [vmem:[%s1895_s9 + $0x8] sm:$0xff]  ;;  %v1262_v45 = vld [vmem:[%s1895_s9] sm:$0xff] }
0x1bb2   :  { %v1124_v42 = vpop.f32.mrf.mxu1 }
0x1bb3   :  { %v1127_v43 = vadd.f32 %v1124_v42, %v724_v41  ;;  %v1265_v41 = vld [vmem:[%s1895_s9 + $0x18] sm:$0xff]  ;;  %v1264_v42 = vld [vmem:[%s1895_s9 + $0x10] sm:$0xff] }
0x1bb4   :  { %1285 = vmatpush.msrb.mxu2 %v1265_v41 }
0x1bb5   :  { %1464 = vtanh.f32 %v1127_v43  ;;  %v1342_v49 = vmul.f32 -1.442695, %v1127_v43 }
0x1bb6   :  { %1466 = vtanh.f32 %v632_v46  ;;  %1286 = vmatpush.msrb.mxu2 %v1264_v42  ;;  %v1352_v46 = vld [vmem:[%s1894_s8] ss:$0 sm:$0xff] }
0x1bb7   :  { %1468 = vpow2.f32 %v1342_v49 }
0x1bb8   :  { %1287 = vmatpush.msrb.mxu2 %v1263_v44 }
0x1bba   :  { %1288 = vmatpush.msrb.mxu2 %v1262_v45 }
0x1bbb   :  { %v1465_v47 = vpop.eup %1464 }
0x1bbc   :  { %1150 = vrot.lane.b32.xlu2 %v1465_v47, %s1484_s12  ;;  %v1467_v48 = vpop.eup %1466 }
0x1bbd   :  { %v1469_v50 = vpop.eup %1468 }
0x1bbe   :  { %v1131_v51 = vadd.f32 1.0, %v1469_v50  ;;  %v1353_v50 = vld [vmem:[%s1896_s10] ss:$0 sm:$0xff] }
0x1bc0   :  { %1470 = vrcp.f32 %v1131_v51  ;;  %v1143_v52 = vand.u32 2147483648, %v1131_v51  ;;  %vm1137_vm14 = vweird.f32 %v1131_v51  ;;  %v1141_v57 = vand.u32 2147483647, %v1131_v51 }
0x1bc2   :  { %v1144_v59 = vor.u32 1.1754944e-38, %v1143_v52  ;;  %vm1142_vm0 = vcmp.eq.f32.partialorder %v1141_v57, 8.507059e+37 }
0x1bc4   :  { %635 = vrot.lane.b32.xlu2 %v1467_v48, %s1484_s12 }
0x1bc6   :  { %v1471_v53 = vpop.eup %1470 }
0x1bc7   :  { %v1133_v54 = vmul.f32 %v1471_v53, %v1131_v51  ;;  %vm1138_vm13 = vweird.f32 %v1471_v53 }
0x1bc8   :  { %vm1139_vm15 = vmor %vm1137_vm14, %vm1138_vm13 }
0x1bc9   :  { %v1134_v11 = vsub.f32 1.0, %v1133_v54 }
0x1bcb   :  { %v1135_v55 = vmul.f32 %v1471_v53, %v1134_v11 }
0x1bcd   :  { %v1136_v56 = vadd.f32 %v1471_v53, %v1135_v55 }
0x1bcf   :  { %v1140_v58 = vsel %vm1139_vm15, %v1471_v53, %v1136_v56 }
0x1bd0   :  { %v1145_v61 = vsel %vm1142_vm0, %v1144_v59, %v1140_v58 }
0x1bd1   :  { %v1148_v6 = vmul.f32 %v1145_v61, %v1827_v22 }
0x1c16   :  { %v1151_v60 = vpop.permute.xlu2 %1150 }
0x1c17   :  { %v1153_v62 = vmul.f32 %v1151_v60, %v1145_v61 }
0x1c19   :  { %1155 = vrot.lane.b32.xlu1 %v1153_v62, %s1484_s12 }
0x1c1e   :  { %v636_v63 = vpop.permute.xlu2 %635 }
0x1c1f   :  { %v638_v1 = vmul.f32 %v636_v63, %v619_v37  ;;  %v1229_v37 = vld [vmem:[%s1893_s7 + $0x8] sm:$0xff] }
0x1c20   :  { %1255 = vmatpush.msrb.mxu1 %v1229_v37 }
0x1c21   :  { %640 = vrot.lane.b32.xlu1 %v638_v1, %s1485_s13 }
0x1c22   :  { %1256 = vmatpush.msrb.mxu1 %v1228_v38 }
0x1c8b   :  { %v1156_v9 = vpop.permute.xlu1 %1155 }
0x1c8c   :  { %v1158_v14 = vadd.f32 %v1156_v9, %v1148_v6 }
0x1c8e   :  { %1472 = vtanh.f32 %v1158_v14 }
0x1c93   :  { %v641_v15 = vpop.permute.xlu1 %640 }
0x1c94   :  { %v1473_v16 = vpop.eup %1472  ;;  %643 = vst.msk [vmem:[#allocation2 + $0x38] sm:$0xff] %vm122_vm5, %v641_v15 }
0x1c95   :  { %1161 = vrot.lane.b32.xlu0 %v1473_v16, %s1484_s12 }
0x1c9b   :  { %v651_v2 = vld [vmem:[#allocation2 + $0x38] sm:$0xff] }
0x1c9c   :  { %1329 = vmatmul.msk.f32.gmra.mxu3 %vm122_vm5, %v651_v2 }
0x1d07   :  { %v1162_v3 = vpop.permute.xlu0 %1161 }
0x1d08   :  { %v1164_v7 = vmul.f32 %v1162_v3, %v1145_v61 }
0x1d0a   :  { %1166 = vrot.lane.b32.xlu2 %v1164_v7, %s1485_s13 }
0x1d1f   :  { %v726_v18 = vpop.f32.mrf.mxu3 }
0x1d20   :  { %v727_v5 = vadd.f32 %v1757_v17, %v726_v18 }
0x1d64   :  { %v1167_v4 = vpop.permute.xlu2 %1166 }
0x1d65   :  { %1343 = vmatmul.msk.f32.vlgmr.msra.gmra.mxu2 %vm122_vm5, %v1167_v4 }
0x1de8   :  { %v1187_v19 = vpop.f32.mrf.mxu2 }
0x1de9   :  { %v1190_v20 = vadd.f32 %v1187_v19, %v727_v5 }
0x1deb   :  { %1474 = vtanh.f32 %v1190_v20  ;;  %v1344_v21 = vmul.f32 -1.442695, %v1190_v20 }
0x1ded   :  { %1476 = vpow2.f32 %v1344_v21 }
0x1df1   :  { %v1475_v10 = vpop.eup %1474 }
0x1df2   :  { %1213 = vrot.lane.b32.xlu0 %v1475_v10, %s1484_s12 }
0x1df3   :  { %v1477_v8 = vpop.eup %1476 }
0x1df4   :  { %v1194_v12 = vadd.f32 1.0, %v1477_v8 }
0x1df6   :  { %1478 = vrcp.f32 %v1194_v12  ;;  %v1206_v25 = vand.u32 2147483648, %v1194_v12  ;;  %vm1200_vm2 = vweird.f32 %v1194_v12  ;;  %v1204_v17 = vand.u32 2147483647, %v1194_v12 }
0x1df8   :  { %v1207_v27 = vor.u32 1.1754944e-38, %v1206_v25  ;;  %vm1205_vm4 = vcmp.eq.f32.partialorder %v1204_v17, 8.507059e+37 }
0x1dfc   :  { %v1479_v22 = vpop.eup %1478 }
0x1dfd   :  { %v1196_v13 = vmul.f32 %v1479_v22, %v1194_v12  ;;  %vm1201_vm1 = vweird.f32 %v1479_v22 }
0x1dfe   :  { %vm1202_vm3 = vmor %vm1200_vm2, %vm1201_vm1 }
0x1dff   :  { %v1197_v23 = vsub.f32 1.0, %v1196_v13 }
0x1e01   :  { %v1198_v0 = vmul.f32 %v1479_v22, %v1197_v23 }
0x1e03   :  { %v1199_v24 = vadd.f32 %v1479_v22, %v1198_v0 }
0x1e05   :  { %v1203_v26 = vsel %vm1202_vm3, %v1479_v22, %v1199_v24 }
0x1e06   :  { %v1208_v29 = vsel %vm1205_vm4, %v1207_v27, %v1203_v26 }
0x1e07   :  { %v1211_v31 = vmul.f32 %v1208_v29, %v1158_v14 }
0x1e64   :  { %v1214_v28 = vpop.permute.xlu0 %1213 }
0x1e65   :  { %v1216_v30 = vmul.f32 %v1214_v28, %v1208_v29 }
0x1e67   :  { %1218 = vrot.lane.b32.xlu1 %v1216_v30, %s1484_s12 }
0x1ed9   :  { %v1219_v32 = vpop.permute.xlu1 %1218 }
0x1eda   :  { %v1221_v33 = vadd.f32 %v1219_v32, %v1211_v31 }
0x1edc   :  { %1480 = vtanh.f32 %v1221_v33 }
0x1ee2   :  { %v1481_v34 = vpop.eup %1480 }
0x1ee3   :  { %1224 = vrot.lane.b32.xlu2 %v1481_v34, %s1484_s12 }
0x1f3d   :  { %v1225_v39 = vpop.permute.xlu2 %1224 }
0x1f3e   :  { %v1227_v40 = vmul.f32 %v1225_v39, %v1208_v29 }
0x1f40   :  { %1237 = vrot.lane.b32.xlu0 %v1227_v40, %s1485_s13 }
0x1fb2   :  { %v1238_v43 = vpop.permute.xlu0 %1237 }
0x1fb3   :  { %1345 = vmatmul.msk.f32.vlgmr.msrb.gmra.mxu1 %vm122_vm5, %v1238_v43 }
0x2030   :  { %v1258_v47 = vpop.f32.mrf.mxu1 }
0x2031   :  { %v1259_v48 = vadd.f32 %v1352_v46, %v1258_v47 }
0x2033   :  { %v1261_v49 = vmax.f32 %v1259_v48, 0.0 }
0x2035   :  { %1346 = vmatmul.msk.f32.vlgmr.msrb.gmra.mxu2 %vm122_vm5, %v1261_v49 }
0x20b8   :  { %v1290_v51 = vpop.f32.mrf.mxu2 }
0x20b9   :  { %v1291_v53 = vadd.f32 %v1353_v50, %v1290_v51 }
0x20bb   :  { %1294 = vst.msk [vmem:[%s1897_s11] sm:$0xff] %vm1293_vm6, %v1291_v53 }

</bundles_post_ra>
